<compile_context>
chip_gen: v7x
topology: tpu7x:2x2x1
jax: 0.10.0
libtpu: 0.0.40
codegen_flags: <defaults>
</compile_context>

<pallas_src>
import functools

import jax
import jax.numpy as jnp
from jax import lax
from jax.experimental import pallas as pl
from jax.experimental.pallas import tpu as pltpu


# ----------------------------------------------------------------------------
# Kernel: whole Block forward for B_TILE batch elements per grid step.
# ----------------------------------------------------------------------------
def block_kernel(x_ref, w1_ref, b1_ref, wqkv_ref, bqkv_ref, rel_ref, mask_ref,
                 s2_ref, t2_ref, w3_ref, b3_ref, o_ref, y_scr,
                 *, heads, b_tile, lp, tq, apply_mask):
    f32, bf16 = jnp.float32, jnp.bfloat16
    C = w1_ref.shape[0]
    d = C // heads

    x = x_ref[...]                                   # (C_in, b_tile*lp) bf16

    # --- conv1 (1x1, bn1 folded) + ReLU: one wide (C, C_in)@(C_in, B*Lp) push
    h1 = jnp.dot(w1_ref[...], x, preferred_element_type=f32)
    h1 = jnp.maximum(h1 + b1_ref[...], 0.0)          # (C, b_tile*lp) f32

    # --- fused q/k/v projection: one (3C, C) @ (C, B*Lp) MXU push ------------
    qkv = jnp.dot(wqkv_ref[...], h1.astype(bf16), preferred_element_type=f32)
    qkv = qkv + bqkv_ref[...]                        # (3C, b_tile*lp) f32

    rel = rel_ref[...]                               # (heads, d, lp) bf16, resident

    for b in range(b_tile):                          # static; lane-aligned slices
        qkv_b = qkv[:, b * lp:(b + 1) * lp].reshape(heads, 3 * d, lp)
        q = qkv_b[:, :d, :].astype(bf16)             # (heads, d, lp)
        k = qkv_b[:, d:2 * d, :].astype(bf16)
        v = qkv_b[:, 2 * d:, :].astype(bf16)

        for q0 in range(0, lp, tq):                  # query-row chunking
            q_c = q[:, :, q0:q0 + tq]                # (heads, d, tq)
            rel_c = rel[:, :, q0:q0 + tq]
            # energy[h,i,j] = sum_d q[h,d,i]*k[h,d,j] + sum_d rel[h,d,i]*q[h,d,j]
            sim = lax.dot_general(q_c, k, (((1,), (1,)), ((0,), (0,))),
                                  preferred_element_type=f32)   # (heads, tq, lp)
            qpos = lax.dot_general(rel_c, q, (((1,), (1,)), ((0,), (0,))),
                                   preferred_element_type=f32)  # (heads, tq, lp)
            energy = sim + qpos
            if apply_mask:                           # -1e30 on padded key columns
                energy = energy + mask_ref[...]

            # --- softmax (f32; denominator reciprocal on the EUP) ------------
            energy = energy - jnp.max(energy, axis=-1, keepdims=True)
            p = jnp.exp(energy)
            attn = (p * pl.reciprocal(jnp.sum(p, axis=-1, keepdims=True),
                                      approx=True)).astype(bf16)

            # out[h,d,i] = sum_j v[h,d,j] * attn[h,i,j]  (no explicit transpose)
            out_c = lax.dot_general(v, attn, (((2,), (2,)), ((0,), (0,))),
                                    preferred_element_type=f32)  # (heads, d, tq)
            y_c = out_c.reshape(C, tq)

            # --- bn2 + ReLU, stage bf16 for conv3 ----------------------------
            h2 = jnp.maximum(s2_ref[...] * y_c + t2_ref[...], 0.0)
            y_scr[:, b * lp + q0:b * lp + q0 + tq] = h2.astype(bf16)

    # --- conv3 (1x1, bn3 folded) + residual + ReLU (lanes = b_tile*lp) --------
    h3 = jnp.dot(w3_ref[...], y_scr[...], preferred_element_type=f32)
    o_ref[...] = jnp.maximum(h3 + b3_ref[...] + x.astype(f32), 0.0
                             ).astype(o_ref.dtype)


# ----------------------------------------------------------------------------
# Wrapper: parameter folding, lane-dense batch packing, pallas_call.
# ----------------------------------------------------------------------------
def _fold_bn(gamma, beta, mean, var, eps=1e-5):
    s = gamma / jnp.sqrt(var + eps)
    t = beta - mean * s
    return s, t


def block_pallas(x, p, heads):
    """x: (N, C_in, W, H) f32. Returns (N, C_in, W, H) f32."""
    f32, bf16 = jnp.float32, jnp.bfloat16
    N, C_in, W, H = x.shape
    C = p["w1"].shape[0]                 # bottleneck channels
    C_out = p["w3"].shape[0]             # = 4 * C
    assert C % heads == 0, "heads must divide channels"
    assert C_in == C_out, "residual path requires in_channels == channels * 4"
    d = C // heads
    L = W * H
    Lp = ((L + 127) // 128) * 128        # lane-dense spatial length
    apply_mask = Lp != L

    # Batch tile: fold batches into the lane axis until each 1x1-conv matmul
    # sees >= 256 lanes (fills the 2x256 MXU on v6e/v7x; multiple pushes on v5e).
    b_tile = max(1, min(N, 256 // Lp))
    while N % b_tile:
        b_tile -= 1
    grid = N // b_tile
    lanes = b_tile * Lp

    tq = min(Lp, 128)                    # query-row chunk (VMEM O(tq*Lp))

    # Fold BN into the adjacent 1x1 convs / per-channel affine.
    s1, t1 = _fold_bn(*p["bn1"])
    s2, t2 = _fold_bn(*p["bn2"])
    s3, t3 = _fold_bn(*p["bn3"])

    w1f = (s1[:, None] * p["w1"]).astype(bf16)                     # (C, C_in)
    b1f = (s1 * p["b1"] + t1)[:, None].astype(f32)                 # (C, 1)
    w3f = (s3[:, None] * p["w3"]).astype(bf16)                     # (C_out, C)
    b3f = (s3 * p["b3"] + t3)[:, None].astype(f32)                 # (C_out, 1)
    s2c = s2[:, None].astype(f32)                                  # (C, 1)
    t2c = t2[:, None].astype(f32)

    # Fused qkv weight, per-head row order [q_h; k_h; v_h] -> (3C, C).
    def per_head(a):
        return a.reshape(heads, d, *a.shape[1:])

    wqkv = jnp.concatenate([per_head(p["wq"]), per_head(p["wk"]),
                            per_head(p["wv"])], axis=1).reshape(3 * C, C).astype(bf16)
    bqkv = jnp.concatenate([per_head(p["bq"]), per_head(p["bk"]),
                            per_head(p["bv"])], axis=1).reshape(3 * C)[:, None].astype(f32)

    # Relative position embedding -> (heads, d, Lp) bf16, zero-padded columns.
    rel = (p["rel_h"] + p["rel_w"]).reshape(heads, d, L)
    rel = jnp.pad(rel, ((0, 0), (0, 0), (0, Lp - L))).astype(bf16)

    # Additive key-column mask: 0 on valid columns, -1e30 on padded ones.
    mask = jnp.where(jnp.arange(Lp) < L, 0.0, -1e30).astype(f32)[None, :]

    # Pack x channel-major with batch folded into lanes: (C_in, N*Lp), bf16.
    x_pad = jnp.pad(x.reshape(N, C_in, L), ((0, 0), (0, 0), (0, Lp - L)))
    x_pack = x_pad.transpose(1, 0, 2).reshape(C_in, N * Lp).astype(bf16)

    out = pl.pallas_call(
        functools.partial(block_kernel, heads=heads, b_tile=b_tile, lp=Lp,
                          tq=tq, apply_mask=apply_mask),
        out_shape=jax.ShapeDtypeStruct((C_out, N * Lp), f32),
        grid_spec=pltpu.PrefetchScalarGridSpec(
            num_scalar_prefetch=0,
            grid=(grid,),
            in_specs=[
                pl.BlockSpec((C_in, lanes), lambda g: (0, g)),       # x (batch tile)
                pl.BlockSpec((C, C_in), lambda g: (0, 0)),           # w1 (resident)
                pl.BlockSpec((C, 1), lambda g: (0, 0)),              # b1
                pl.BlockSpec((3 * C, C), lambda g: (0, 0)),          # wqkv
                pl.BlockSpec((3 * C, 1), lambda g: (0, 0)),          # bqkv
                pl.BlockSpec((heads, d, Lp), lambda g: (0, 0, 0)),   # rel (bf16)
                pl.BlockSpec((1, Lp), lambda g: (0, 0)),             # key mask
                pl.BlockSpec((C, 1), lambda g: (0, 0)),              # bn2 scale
                pl.BlockSpec((C, 1), lambda g: (0, 0)),              # bn2 shift
                pl.BlockSpec((C_out, C), lambda g: (0, 0)),          # w3
                pl.BlockSpec((C_out, 1), lambda g: (0, 0)),          # b3
            ],
            out_specs=pl.BlockSpec((C_out, lanes), lambda g: (0, g)),
            scratch_shapes=[pltpu.VMEM((C, lanes), bf16)],           # post-MHSA acts
        ),
        compiler_params=pltpu.CompilerParams(
            dimension_semantics=("parallel",),
            vmem_limit_bytes=32 * 1024 * 1024,
        ),
    )(x_pack, w1f, b1f, wqkv, bqkv, rel, mask, s2c, t2c, w3f, b3f)

    out = out.reshape(C_out, N, Lp)[:, :, :L].transpose(1, 0, 2)
    return out.reshape(N, C_out, W, H)


# ----------------------------------------------------------------------------
# Pure-JAX f32 reference mirroring the PyTorch Block (eval-mode BN).
# ----------------------------------------------------------------------------
_PREC = lax.Precision.HIGHEST


def _conv1x1_ref(x, w, b):
    return jnp.einsum("oc,nchw->nohw", w, x, precision=_PREC) + b[None, :, None, None]


def _bn_ref(x, gamma, beta, mean, var, eps=1e-5):
    inv = gamma / jnp.sqrt(var + eps)
    return (x - mean[None, :, None, None]) * inv[None, :, None, None] \
        + beta[None, :, None, None]


def _mhsa_ref(x, wq, bq, wk, bk, wv, bv, rel_h, rel_w, heads):
    N, C, W, H = x.shape
    L, d = W * H, C // heads
    xf = x.reshape(N, C, L)

    def proj(w, b):
        y = jnp.einsum("oc,ncl->nol", w, xf, precision=_PREC) + b[None, :, None]
        return y.reshape(N, heads, d, L)

    q, k, v = proj(wq, bq), proj(wk, bk), proj(wv, bv)
    sim = jnp.einsum("nhdi,nhdj->nhij", q, k, precision=_PREC)
    rel = (rel_h + rel_w).reshape(heads, d, L)
    qpos = jnp.einsum("hdi,nhdj->nhij", rel, q, precision=_PREC)
    attn = jax.nn.softmax(sim + qpos, axis=-1)
    out = jnp.einsum("nhdj,nhij->nhdi", v, attn, precision=_PREC)
    return out.reshape(N, C, W, H)


def block_reference(x, p, heads):
    h = jnp.maximum(_bn_ref(_conv1x1_ref(x, p["w1"], p["b1"]), *p["bn1"]), 0.0)
    y = _mhsa_ref(h, p["wq"], p["bq"], p["wk"], p["bk"], p["wv"], p["bv"],
                  p["rel_h"], p["rel_w"], heads)
    y = jnp.maximum(_bn_ref(y, *p["bn2"]), 0.0)
    z = _bn_ref(_conv1x1_ref(y, p["w3"], p["b3"]), *p["bn3"])
    return jnp.maximum(z + x, 0.0)


# ----------------------------------------------------------------------------
if __name__ == "__main__":
    # Block(in_channels=64, channels=16, mhsa=True, heads=2, shape=(8, 16)).
    # W*H = 128 is lane-exact (no padded key columns -> no wasted softmax work).
    N, channels, heads, expansion = 4, 16, 2, 4
    C_in = channels * expansion           # 64 (== channels*4 so the residual adds)
    W, H = 8, 16                          # L = 128
    d = channels // heads

    keys = iter(jax.random.split(jax.random.PRNGKey(0), 32))

    def nrm(shape, scale=1.0):
        return scale * jax.random.normal(next(keys), shape, dtype=jnp.float32)

    def bn_params(c):
        return (1.0 + 0.1 * nrm((c,)),        # gamma
                0.1 * nrm((c,)),              # beta
                0.1 * nrm((c,)),              # running mean
                0.5 + jnp.abs(nrm((c,))))     # running var (> 0)

    x = nrm((N, C_in, W, H))
    params = dict(
        w1=nrm((channels, C_in), 0.1), b1=nrm((channels,), 0.1),
        bn1=bn_params(channels),
        wq=nrm((channels, channels), 0.1), bq=nrm((channels,), 0.1),
        wk=nrm((channels, channels), 0.1), bk=nrm((channels,), 0.1),
        wv=nrm((channels, channels), 0.1), bv=nrm((channels,), 0.1),
        rel_h=nrm((1, heads, d, 1, H)), rel_w=nrm((1, heads, d, W, 1)),
        bn2=bn_params(channels),
        w3=nrm((C_in, channels), 0.1), b3=nrm((C_in,), 0.1),
        bn3=bn_params(C_in),
    )

    out = jax.block_until_ready(block_pallas(x, params, heads))
    ref = block_reference(x, params, heads)

    assert out.shape == (N, C_in, W, H)
    max_err = jnp.max(jnp.abs(out - ref))
    # Tolerance accounts for deliberate bf16 matmul operands / bf16 x DMA /
    # approx EUP reciprocal (inference-grade precision).
    assert jnp.allclose(out, ref, atol=5e-2, rtol=5e-2), \
        f"mismatch vs reference (max|diff| = {max_err})"
    print("KERNEL_OK")
</pallas_src>

<mosaic_0001>
module attributes {stable_mosaic.version = 11 : i64} {
  func.func @block_kernel(%arg0: i32, %arg1: memref<64x256xbf16, #tpu.memory_space<vmem>>, %arg2: memref<16x64xbf16, #tpu.memory_space<vmem>>, %arg3: memref<16x1xf32, #tpu.memory_space<vmem>>, %arg4: memref<48x16xbf16, #tpu.memory_space<vmem>>, %arg5: memref<48x1xf32, #tpu.memory_space<vmem>>, %arg6: memref<2x8x128xbf16, #tpu.memory_space<vmem>>, %arg7: memref<1x128xf32, #tpu.memory_space<vmem>>, %arg8: memref<16x1xf32, #tpu.memory_space<vmem>>, %arg9: memref<16x1xf32, #tpu.memory_space<vmem>>, %arg10: memref<64x16xbf16, #tpu.memory_space<vmem>>, %arg11: memref<64x1xf32, #tpu.memory_space<vmem>>, %arg12: memref<64x256xf32, #tpu.memory_space<vmem>>, %arg13: memref<16x256xbf16, #tpu.memory_space<vmem>>) attributes {dimension_semantics = [#tpu.dimension_semantics<parallel>], iteration_bounds = array<i64: 2>, scalar_prefetch = 0 : i64, scratch_operands = 1 : i64, tpu.core_type = #tpu.core_type<tc>, window_params = [{transform_indices = @transform_0, window_bounds = array<i64: 64, 256>}, {pipeline_mode = #tpu.pipeline_mode<synchronous>, transform_indices = @transform_1, window_bounds = array<i64: 16, 64>}, {pipeline_mode = #tpu.pipeline_mode<synchronous>, transform_indices = @transform_2, window_bounds = array<i64: 16, 1>}, {pipeline_mode = #tpu.pipeline_mode<synchronous>, transform_indices = @transform_3, window_bounds = array<i64: 48, 16>}, {pipeline_mode = #tpu.pipeline_mode<synchronous>, transform_indices = @transform_4, window_bounds = array<i64: 48, 1>}, {pipeline_mode = #tpu.pipeline_mode<synchronous>, transform_indices = @transform_5, window_bounds = array<i64: 2, 8, 128>}, {pipeline_mode = #tpu.pipeline_mode<synchronous>, transform_indices = @transform_6, window_bounds = array<i64: 1, 128>}, {pipeline_mode = #tpu.pipeline_mode<synchronous>, transform_indices = @transform_7, window_bounds = array<i64: 16, 1>}, {pipeline_mode = #tpu.pipeline_mode<synchronous>, transform_indices = @transform_8, window_bounds = array<i64: 16, 1>}, {pipeline_mode = #tpu.pipeline_mode<synchronous>, transform_indices = @transform_9, window_bounds = array<i64: 64, 16>}, {pipeline_mode = #tpu.pipeline_mode<synchronous>, transform_indices = @transform_10, window_bounds = array<i64: 64, 1>}, {transform_indices = @transform_11, window_bounds = array<i64: 64, 256>}]} {
    %c0 = arith.constant 0 : index
    %c0_0 = arith.constant 0 : index
    %0 = vector.load %arg1[%c0, %c0_0] : memref<64x256xbf16, #tpu.memory_space<vmem>>, vector<64x256xbf16>
    %c0_1 = arith.constant 0 : index
    %c0_2 = arith.constant 0 : index
    %1 = vector.load %arg2[%c0_1, %c0_2] : memref<16x64xbf16, #tpu.memory_space<vmem>>, vector<16x64xbf16>
    %cst = arith.constant dense<0.000000e+00> : vector<16x256xf32>
    %2 = tpu.matmul %1, %0, %cst {dimension_numbers = #tpu.dot_dimension_numbers<[1], [0], [0], [1], [0, 0, 1, 1], [], []>} : vector<16x64xbf16>, vector<64x256xbf16>, vector<16x256xf32> -> vector<16x256xf32>
    %c0_3 = arith.constant 0 : index
    %c0_4 = arith.constant 0 : index
    %3 = vector.load %arg3[%c0_3, %c0_4] : memref<16x1xf32, #tpu.memory_space<vmem>>, vector<16x1xf32>
    %4 = vector.broadcast %3 : vector<16x1xf32> to vector<16x256xf32>
    %5 = arith.addf %2, %4 : vector<16x256xf32>
    %cst_5 = arith.constant 0.000000e+00 : f32
    %6 = vector.broadcast %cst_5 : f32 to vector<16x256xf32>
    %7 = arith.maximumf %5, %6 : vector<16x256xf32>
    %c0_6 = arith.constant 0 : index
    %c0_7 = arith.constant 0 : index
    %8 = vector.load %arg4[%c0_6, %c0_7] : memref<48x16xbf16, #tpu.memory_space<vmem>>, vector<48x16xbf16>
    %9 = arith.truncf %7 : vector<16x256xf32> to vector<16x256xbf16>
    %cst_8 = arith.constant dense<0.000000e+00> : vector<48x256xf32>
    %10 = tpu.matmul %8, %9, %cst_8 {dimension_numbers = #tpu.dot_dimension_numbers<[1], [0], [0], [1], [0, 0, 1, 1], [], []>} : vector<48x16xbf16>, vector<16x256xbf16>, vector<48x256xf32> -> vector<48x256xf32>
    %c0_9 = arith.constant 0 : index
    %c0_10 = arith.constant 0 : index
    %11 = vector.load %arg5[%c0_9, %c0_10] : memref<48x1xf32, #tpu.memory_space<vmem>>, vector<48x1xf32>
    %12 = vector.broadcast %11 : vector<48x1xf32> to vector<48x256xf32>
    %13 = arith.addf %10, %12 : vector<48x256xf32>
    %c0_11 = arith.constant 0 : index
    %c0_12 = arith.constant 0 : index
    %c0_13 = arith.constant 0 : index
    %14 = vector.load %arg6[%c0_11, %c0_12, %c0_13] : memref<2x8x128xbf16, #tpu.memory_space<vmem>>, vector<2x8x128xbf16>
    %15 = vector.extract_strided_slice %13 {offsets = [0, 0], sizes = [48, 128], strides = [1, 1]} : vector<48x256xf32> to vector<48x128xf32>
    %16 = vector.shape_cast %15 : vector<48x128xf32> to vector<2x24x128xf32>
    %17 = vector.extract_strided_slice %16 {offsets = [0, 0, 0], sizes = [2, 8, 128], strides = [1, 1, 1]} : vector<2x24x128xf32> to vector<2x8x128xf32>
    %18 = arith.truncf %17 : vector<2x8x128xf32> to vector<2x8x128xbf16>
    %19 = vector.extract_strided_slice %16 {offsets = [0, 8, 0], sizes = [2, 8, 128], strides = [1, 1, 1]} : vector<2x24x128xf32> to vector<2x8x128xf32>
    %20 = arith.truncf %19 : vector<2x8x128xf32> to vector<2x8x128xbf16>
    %21 = vector.extract_strided_slice %16 {offsets = [0, 16, 0], sizes = [2, 8, 128], strides = [1, 1, 1]} : vector<2x24x128xf32> to vector<2x8x128xf32>
    %22 = arith.truncf %21 : vector<2x8x128xf32> to vector<2x8x128xbf16>
    %cst_14 = arith.constant dense<0.000000e+00> : vector<2x128x128xf32>
    %23 = tpu.matmul %18, %20, %cst_14 {dimension_numbers = #tpu.dot_dimension_numbers<[1], [1], [2], [2], [0, 0, 0, 2, 1, 2], [0], [0]>} : vector<2x8x128xbf16>, vector<2x8x128xbf16>, vector<2x128x128xf32> -> vector<2x128x128xf32>
    %cst_15 = arith.constant dense<0.000000e+00> : vector<2x128x128xf32>
    %24 = tpu.matmul %14, %18, %cst_15 {dimension_numbers = #tpu.dot_dimension_numbers<[1], [1], [2], [2], [0, 0, 0, 2, 1, 2], [0], [0]>} : vector<2x8x128xbf16>, vector<2x8x128xbf16>, vector<2x128x128xf32> -> vector<2x128x128xf32>
    %25 = arith.addf %23, %24 : vector<2x128x128xf32>
    %cst_16 = arith.constant dense<0xFF800000> : vector<2x128xf32>
    %26 = vector.multi_reduction <maximumf>, %25, %cst_16 [2] : vector<2x128x128xf32> to vector<2x128xf32>
    %27 = vector.shape_cast %26 : vector<2x128xf32> to vector<2x128x1xf32>
    %28 = vector.broadcast %27 : vector<2x128x1xf32> to vector<2x128x128xf32>
    %29 = arith.subf %25, %28 : vector<2x128x128xf32>
    %30 = math.exp %29 : vector<2x128x128xf32>
    %cst_17 = arith.constant dense<0.000000e+00> : vector<2x128xf32>
    %31 = vector.multi_reduction <add>, %30, %cst_17 [2] : vector<2x128x128xf32> to vector<2x128xf32>
    %32 = vector.shape_cast %31 : vector<2x128xf32> to vector<2x128x1xf32>
    %33 = tpu.reciprocal %32 {approx = true} : vector<2x128x1xf32> -> vector<2x128x1xf32>
    %34 = vector.broadcast %33 : vector<2x128x1xf32> to vector<2x128x128xf32>
    %35 = arith.mulf %30, %34 : vector<2x128x128xf32>
    %36 = arith.truncf %35 : vector<2x128x128xf32> to vector<2x128x128xbf16>
    %cst_18 = arith.constant dense<0.000000e+00> : vector<2x8x128xf32>
    %37 = tpu.matmul %22, %36, %cst_18 {dimension_numbers = #tpu.dot_dimension_numbers<[2], [2], [1], [1], [0, 0, 0, 1, 1, 1], [0], [0]>} : vector<2x8x128xbf16>, vector<2x128x128xbf16>, vector<2x8x128xf32> -> vector<2x8x128xf32>
    %38 = vector.shape_cast %37 : vector<2x8x128xf32> to vector<16x128xf32>
    %c0_19 = arith.constant 0 : index
    %c0_20 = arith.constant 0 : index
    %39 = vector.load %arg8[%c0_19, %c0_20] : memref<16x1xf32, #tpu.memory_space<vmem>>, vector<16x1xf32>
    %40 = vector.broadcast %39 : vector<16x1xf32> to vector<16x128xf32>
    %41 = arith.mulf %40, %38 : vector<16x128xf32>
    %c0_21 = arith.constant 0 : index
    %c0_22 = arith.constant 0 : index
    %42 = vector.load %arg9[%c0_21, %c0_22] : memref<16x1xf32, #tpu.memory_space<vmem>>, vector<16x1xf32>
    %43 = vector.broadcast %42 : vector<16x1xf32> to vector<16x128xf32>
    %44 = arith.addf %41, %43 : vector<16x128xf32>
    %cst_23 = arith.constant 0.000000e+00 : f32
    %45 = vector.broadcast %cst_23 : f32 to vector<16x128xf32>
    %46 = arith.maximumf %44, %45 : vector<16x128xf32>
    %47 = arith.truncf %46 : vector<16x128xf32> to vector<16x128xbf16>
    %c0_24 = arith.constant 0 : index
    %c0_25 = arith.constant 0 : index
    %48 = vector.load %arg13[%c0_24, %c0_25] : memref<16x256xbf16, #tpu.memory_space<vmem>>, vector<16x128xbf16>
    tpu.vector_store %arg13[%c0_24, %c0_25], %47 {strides = array<i32>} : memref<16x256xbf16, #tpu.memory_space<vmem>>, vector<16x128xbf16>,
    %49 = vector.extract_strided_slice %13 {offsets = [0, 128], sizes = [48, 128], strides = [1, 1]} : vector<48x256xf32> to vector<48x128xf32>
    %50 = vector.shape_cast %49 : vector<48x128xf32> to vector<2x24x128xf32>
    %51 = vector.extract_strided_slice %50 {offsets = [0, 0, 0], sizes = [2, 8, 128], strides = [1, 1, 1]} : vector<2x24x128xf32> to vector<2x8x128xf32>
    %52 = arith.truncf %51 : vector<2x8x128xf32> to vector<2x8x128xbf16>
    %53 = vector.extract_strided_slice %50 {offsets = [0, 8, 0], sizes = [2, 8, 128], strides = [1, 1, 1]} : vector<2x24x128xf32> to vector<2x8x128xf32>
    %54 = arith.truncf %53 : vector<2x8x128xf32> to vector<2x8x128xbf16>
    %55 = vector.extract_strided_slice %50 {offsets = [0, 16, 0], sizes = [2, 8, 128], strides = [1, 1, 1]} : vector<2x24x128xf32> to vector<2x8x128xf32>
    %56 = arith.truncf %55 : vector<2x8x128xf32> to vector<2x8x128xbf16>
    %cst_26 = arith.constant dense<0.000000e+00> : vector<2x128x128xf32>
    %57 = tpu.matmul %52, %54, %cst_26 {dimension_numbers = #tpu.dot_dimension_numbers<[1], [1], [2], [2], [0, 0, 0, 2, 1, 2], [0], [0]>} : vector<2x8x128xbf16>, vector<2x8x128xbf16>, vector<2x128x128xf32> -> vector<2x128x128xf32>
    %cst_27 = arith.constant dense<0.000000e+00> : vector<2x128x128xf32>
    %58 = tpu.matmul %14, %52, %cst_27 {dimension_numbers = #tpu.dot_dimension_numbers<[1], [1], [2], [2], [0, 0, 0, 2, 1, 2], [0], [0]>} : vector<2x8x128xbf16>, vector<2x8x128xbf16>, vector<2x128x128xf32> -> vector<2x128x128xf32>
    %59 = arith.addf %57, %58 : vector<2x128x128xf32>
    %cst_28 = arith.constant dense<0xFF800000> : vector<2x128xf32>
    %60 = vector.multi_reduction <maximumf>, %59, %cst_28 [2] : vector<2x128x128xf32> to vector<2x128xf32>
    %61 = vector.shape_cast %60 : vector<2x128xf32> to vector<2x128x1xf32>
    %62 = vector.broadcast %61 : vector<2x128x1xf32> to vector<2x128x128xf32>
    %63 = arith.subf %59, %62 : vector<2x128x128xf32>
    %64 = math.exp %63 : vector<2x128x128xf32>
    %cst_29 = arith.constant dense<0.000000e+00> : vector<2x128xf32>
    %65 = vector.multi_reduction <add>, %64, %cst_29 [2] : vector<2x128x128xf32> to vector<2x128xf32>
    %66 = vector.shape_cast %65 : vector<2x128xf32> to vector<2x128x1xf32>
    %67 = tpu.reciprocal %66 {approx = true} : vector<2x128x1xf32> -> vector<2x128x1xf32>
    %68 = vector.broadcast %67 : vector<2x128x1xf32> to vector<2x128x128xf32>
    %69 = arith.mulf %64, %68 : vector<2x128x128xf32>
    %70 = arith.truncf %69 : vector<2x128x128xf32> to vector<2x128x128xbf16>
    %cst_30 = arith.constant dense<0.000000e+00> : vector<2x8x128xf32>
    %71 = tpu.matmul %56, %70, %cst_30 {dimension_numbers = #tpu.dot_dimension_numbers<[2], [2], [1], [1], [0, 0, 0, 1, 1, 1], [0], [0]>} : vector<2x8x128xbf16>, vector<2x128x128xbf16>, vector<2x8x128xf32> -> vector<2x8x128xf32>
    %72 = vector.shape_cast %71 : vector<2x8x128xf32> to vector<16x128xf32>
    %c0_31 = arith.constant 0 : index
    %c0_32 = arith.constant 0 : index
    %73 = vector.load %arg8[%c0_31, %c0_32] : memref<16x1xf32, #tpu.memory_space<vmem>>, vector<16x1xf32>
    %74 = vector.broadcast %73 : vector<16x1xf32> to vector<16x128xf32>
    %75 = arith.mulf %74, %72 : vector<16x128xf32>
    %c0_33 = arith.constant 0 : index
    %c0_34 = arith.constant 0 : index
    %76 = vector.load %arg9[%c0_33, %c0_34] : memref<16x1xf32, #tpu.memory_space<vmem>>, vector<16x1xf32>
    %77 = vector.broadcast %76 : vector<16x1xf32> to vector<16x128xf32>
    %78 = arith.addf %75, %77 : vector<16x128xf32>
    %cst_35 = arith.constant 0.000000e+00 : f32
    %79 = vector.broadcast %cst_35 : f32 to vector<16x128xf32>
    %80 = arith.maximumf %78, %79 : vector<16x128xf32>
    %81 = arith.truncf %80 : vector<16x128xf32> to vector<16x128xbf16>
    %c0_36 = arith.constant 0 : index
    %c128 = arith.constant 128 : index
    %82 = vector.load %arg13[%c0_36, %c128] : memref<16x256xbf16, #tpu.memory_space<vmem>>, vector<16x128xbf16>
    tpu.vector_store %arg13[%c0_36, %c128], %81 {strides = array<i32>} : memref<16x256xbf16, #tpu.memory_space<vmem>>, vector<16x128xbf16>,
    %c0_37 = arith.constant 0 : index
    %c0_38 = arith.constant 0 : index
    %83 = vector.load %arg10[%c0_37, %c0_38] : memref<64x16xbf16, #tpu.memory_space<vmem>>, vector<64x16xbf16>
    %c0_39 = arith.constant 0 : index
    %c0_40 = arith.constant 0 : index
    %84 = vector.load %arg13[%c0_39, %c0_40] : memref<16x256xbf16, #tpu.memory_space<vmem>>, vector<16x256xbf16>
    %cst_41 = arith.constant dense<0.000000e+00> : vector<64x256xf32>
    %85 = tpu.matmul %83, %84, %cst_41 {dimension_numbers = #tpu.dot_dimension_numbers<[1], [0], [0], [1], [0, 0, 1, 1], [], []>} : vector<64x16xbf16>, vector<16x256xbf16>, vector<64x256xf32> -> vector<64x256xf32>
    %c0_42 = arith.constant 0 : index
    %c0_43 = arith.constant 0 : index
    %86 = vector.load %arg11[%c0_42, %c0_43] : memref<64x1xf32, #tpu.memory_space<vmem>>, vector<64x1xf32>
    %87 = vector.broadcast %86 : vector<64x1xf32> to vector<64x256xf32>
    %88 = arith.addf %85, %87 : vector<64x256xf32>
    %89 = arith.extf %0 : vector<64x256xbf16> to vector<64x256xf32>
    %90 = arith.addf %88, %89 : vector<64x256xf32>
    %cst_44 = arith.constant 0.000000e+00 : f32
    %91 = vector.broadcast %cst_44 : f32 to vector<64x256xf32>
    %92 = arith.maximumf %90, %91 : vector<64x256xf32>
    %c0_45 = arith.constant 0 : index
    %c0_46 = arith.constant 0 : index
    %93 = vector.load %arg12[%c0_45, %c0_46] : memref<64x256xf32, #tpu.memory_space<vmem>>, vector<64x256xf32>
    tpu.vector_store %arg12[%c0_45, %c0_46], %92 {strides = array<i32>} : memref<64x256xf32, #tpu.memory_space<vmem>>, vector<64x256xf32>,
    return
  }
  func.func @transform_0(%arg0: i32) -> (i32, i32) {
    %c0_i32 = arith.constant 0 : i32
    %c0_i32_0 = arith.constant 0 : i32
    return %c0_i32, %arg0 : i32, i32
  }
  func.func @transform_1(%arg0: i32) -> (i32, i32) {
    %c0_i32 = arith.constant 0 : i32
    %c0_i32_0 = arith.constant 0 : i32
    %c0_i32_1 = arith.constant 0 : i32
    return %c0_i32, %c0_i32_0 : i32, i32
  }
  func.func @transform_2(%arg0: i32) -> (i32, i32) {
    %c0_i32 = arith.constant 0 : i32
    %c0_i32_0 = arith.constant 0 : i32
    %c0_i32_1 = arith.constant 0 : i32
    return %c0_i32, %c0_i32_0 : i32, i32
  }
  func.func @transform_3(%arg0: i32) -> (i32, i32) {
    %c0_i32 = arith.constant 0 : i32
    %c0_i32_0 = arith.constant 0 : i32
    %c0_i32_1 = arith.constant 0 : i32
    return %c0_i32, %c0_i32_0 : i32, i32
  }
  func.func @transform_4(%arg0: i32) -> (i32, i32) {
    %c0_i32 = arith.constant 0 : i32
    %c0_i32_0 = arith.constant 0 : i32
    %c0_i32_1 = arith.constant 0 : i32
    return %c0_i32, %c0_i32_0 : i32, i32
  }
  func.func @transform_5(%arg0: i32) -> (i32, i32, i32) {
    %c0_i32 = arith.constant 0 : i32
    %c0_i32_0 = arith.constant 0 : i32
    %c0_i32_1 = arith.constant 0 : i32
    %c0_i32_2 = arith.constant 0 : i32
    return %c0_i32, %c0_i32_0, %c0_i32_1 : i32, i32, i32
  }
  func.func @transform_6(%arg0: i32) -> (i32, i32) {
    %c0_i32 = arith.constant 0 : i32
    %c0_i32_0 = arith.constant 0 : i32
    %c0_i32_1 = arith.constant 0 : i32
    return %c0_i32, %c0_i32_0 : i32, i32
  }
  func.func @transform_7(%arg0: i32) -> (i32, i32) {
    %c0_i32 = arith.constant 0 : i32
    %c0_i32_0 = arith.constant 0 : i32
    %c0_i32_1 = arith.constant 0 : i32
    return %c0_i32, %c0_i32_0 : i32, i32
  }
  func.func @transform_8(%arg0: i32) -> (i32, i32) {
    %c0_i32 = arith.constant 0 : i32
    %c0_i32_0 = arith.constant 0 : i32
    %c0_i32_1 = arith.constant 0 : i32
    return %c0_i32, %c0_i32_0 : i32, i32
  }
  func.func @transform_9(%arg0: i32) -> (i32, i32) {
    %c0_i32 = arith.constant 0 : i32
    %c0_i32_0 = arith.constant 0 : i32
    %c0_i32_1 = arith.constant 0 : i32
    return %c0_i32, %c0_i32_0 : i32, i32
  }
  func.func @transform_10(%arg0: i32) -> (i32, i32) {
    %c0_i32 = arith.constant 0 : i32
    %c0_i32_0 = arith.constant 0 : i32
    %c0_i32_1 = arith.constant 0 : i32
    return %c0_i32, %c0_i32_0 : i32, i32
  }
  func.func @transform_11(%arg0: i32) -> (i32, i32) {
    %c0_i32 = arith.constant 0 : i32
    %c0_i32_0 = arith.constant 0 : i32
    return %c0_i32, %arg0 : i32, i32
  }
}

</mosaic_0001>

<bundles_post_ra>
// kernel: tpu_custom_call.1
= control target key start
LH: loop header
LB: loop body
LE: loop exit
PB: predicated region body
PF: predicated region fallthrough
CT: control target
= control target key end

     0   :  { %16 = vsyncpa [#allocation5], 0  ;;  %s4880_s0 = inlined_call_operand.vmem [shape: bf16[64,512], index: 0, kind: input, shape index: {}]   ;;  %s4881_s1 = inlined_call_operand.vmem [shape: bf16[16,64], index: 1, kind: input, shape index: {}]   ;;  %s4882_s2 = inlined_call_operand.vmem [shape: f32[16,1], index: 2, kind: input, shape index: {}]   ;;  %s4883_s3 = inlined_call_operand.vmem [shape: bf16[48,16], index: 3, kind: input, shape index: {}]   ;;  %s4884_s4 = inlined_call_operand.vmem [shape: f32[48,1], index: 4, kind: input, shape index: {}]   ;;  %s4885_s5 = inlined_call_operand.vmem [shape: bf16[2,8,128], index: 5, kind: input, shape index: {}]   ;;  %s4886_s6 = inlined_call_operand.vmem [shape: f32[1,128], index: 6, kind: input, shape index: {}]   ;;  %s4887_s7 = inlined_call_operand.vmem [shape: f32[16,1], index: 7, kind: input, shape index: {}]   ;;  %s4888_s8 = inlined_call_operand.vmem [shape: f32[16,1], index: 8, kind: input, shape index: {}]   ;;  %s4889_s9 = inlined_call_operand.vmem [shape: bf16[64,16], index: 9, kind: input, shape index: {}]   ;;  %s4890_s10 = inlined_call_operand.vmem [shape: f32[64,1], index: 10, kind: input, shape index: {}]   ;;  %s4891_s11 = inlined_call_operand.hbm [shape: f32[64,512], index: 11, kind: output, shape index: {}]  }
   0x1   :  { %18 = vsyncpa [#allocation5 + $0x1], 0  ;;  %s3864_s17 = smov 0   ;;  %s3866_s6 = smov 0  }
   0x2   :  { %s3868_s18 = smov 0   ;;  %s3870_s19 = smov 0  }
   0x3 LB: > { %s4892_s20 = sadd.s32 4294967295, %s3795_s19   ;;  %s2898_s21 = sadd.s32 4294967294, %s3795_s19   ;;  %s3795_s19 = sphi %s3870_s19, %s4944_s19   ;;  %s3791_s18 = sphi %s3868_s18, %s4943_s18   ;;  %s3787_s6 = sphi %s3866_s6, %s4942_s6   ;;  %s3783_s17 = sphi %s3864_s17, %s4941_s17  }
   0x4   : > { %s3887_s22 = sadd.s32 1, %s3795_s19   ;;  %s31_s23 = sadd.s32 1, %s3791_s18 }
   0x5   : > { %s28_s24 = ssub.s32 %s3795_s19, %s3887_s22  ;;  %p38_p0 = scmp.ne.s32.totalorder %s3791_s18, %s3787_s6 }
   0x6   : > { %p29_p1 = scmp.eq.s32.totalorder %s28_s24, 0  ;;  %p39_p2 = scmp.eq.s32.totalorder %s3795_s19, 0 }
   0x7   : > { %p278_p3 = scmp.eq.s32.totalorder %s4892_s20, 1  ;;  %p283_p4 = scmp.ne.s32.totalorder %s3787_s6, %s3783_s17 }
   0x8   : > { %s3900_s25 = scalar_select %p29_p1, %s3791_s18, %s31_s23  }
   0x9   : > { %p40_p5 = por %p39_p2, %p38_p0  ;;  %p3902_p6 = por %p278_p3, %p38_p0 }
   0xa   : > { %p284_p7 = scmp.eq.s32.totalorder %s2898_s21, 1  ;;  %p2900_p9 = scmp.ge.s32.totalorder %s3795_s19, 2 }
   0xc   : > { %p3906_p8 = por %p284_p7, %p283_p4  ;;  %330 = sbr.rel (%p2900_p9) target bundleno = 27 (0x1b), region = 56 }
  0x13   : > { %333 = sbr.rel (!%p40_p5) target bundleno = 27 (0x1b), region = 60  ;;  %s335_s28 = sand.u32 (%p40_p5), 1, %s3791_s18  }
  0x14   : > { %s3000_s29 = sshll.u32 (%p40_p5), %s3795_s19, 3  ;;  %s2901_s30 = sshll.u32 (%p40_p5), %s335_s28, 6 }
  0x15   : > { %s340_s14 = scalar_lea.vmem (%p40_p5), %s4880_s0, %s3000_s29  ;;  %s337_s15 = scalar_lea.vmem (%p40_p5), [#allocation3], %s2901_s30 }
  0x16   : > { %v382_v0 = vld [vmem:[%s340_s14] sm:$0xff] (%p40_p5)  ;;  %v384_v1 = vld [vmem:[%s340_s14 + $0x10] sm:$0xff] (%p40_p5) }
  0x17   : > { %v386_v2 = vld [vmem:[%s340_s14 + $0x20] sm:$0xff] (%p40_p5)  ;;  %383 = vst [vmem:[%s337_s15] sm:$0xff] (%p40_p5), %v382_v0  ;;  %385 = vst [vmem:[%s337_s15 + $0x8] sm:$0xff] (%p40_p5), %v384_v1  ;;  %v388_v3 = vld [vmem:[%s340_s14 + $0x30] sm:$0xff] (%p40_p5) }
  0x18   : > { %387 = vst [vmem:[%s337_s15 + $0x10] sm:$0xff] (%p40_p5), %v386_v2  ;;  %v390_v4 = vld [vmem:[%s340_s14 + $0x40] sm:$0xff] (%p40_p5)  ;;  %v392_v5 = vld [vmem:[%s340_s14 + $0x50] sm:$0xff] (%p40_p5)  ;;  %389 = vst [vmem:[%s337_s15 + $0x18] sm:$0xff] (%p40_p5), %v388_v3 }
  0x19   : > { %391 = vst [vmem:[%s337_s15 + $0x20] sm:$0xff] (%p40_p5), %v390_v4  ;;  %393 = vst [vmem:[%s337_s15 + $0x28] sm:$0xff] (%p40_p5), %v392_v5  ;;  %v394_v6 = vld [vmem:[%s340_s14 + $0x60] sm:$0xff] (%p40_p5)  ;;  %v396_v7 = vld [vmem:[%s340_s14 + $0x70] sm:$0xff] (%p40_p5) }
  0x1a   : > { %395 = vst [vmem:[%s337_s15 + $0x30] sm:$0xff] %v394_v6  ;;  %397 = vst [vmem:[%s337_s15 + $0x38] sm:$0xff] %v396_v7 }
  0x1b PF: > { %p2904_p10 = scmp.ge.s32.totalorder %s3795_s19, 1  ;;  %p402_p11 = scmp.lt.s32.totalorder %s3795_s19, 3 }
  0x1d   : > { %p403_p12 = pnand %p2904_p10, %p402_p11 }
  0x1f   : > { %406 = sbr.rel (%p403_p12) target bundleno = 2341 (0x925), region = 98 }
  0x26   : > { %s3921_s16 = sand.u32 1, %s3787_s6   ;;  %v4893_v8 = vmov 0   ;;  %v461_v9 = vld [vmem:[%s4882_s2] sm:$0xff]  ;;  %v462_v10 = vld [vmem:[%s4882_s2 + $0x8] sm:$0xff]  ;;  %vm518_vm0 = vcmask 523264   ;;  %v580_v31 = vld [vmem:[%s4884_s4 + $0x18] sm:$0xff] }
  0x27   : > { %s2905_s21 = sshll.u32 %s3921_s16, 6  ;;  %554 = vmatprep.mubr.bf16.mxu1 %v4893_v8  ;;  %3451 = vset.pattern.permute.xlu0 %v4893_v8  ;;  %v578_v20 = vld [vmem:[%s4884_s4 + $0x8] sm:$0xff]  ;;  %v3461_v28 = vld [vmem:[%s4881_s1] sm:$0xff]   ;;  %vm628_vm1 = vcmask 130048   ;;  %v3464_v52 = vld [vmem:[%s4883_s3 + $0x10] sm:$0xff]   ;;  %vm725_vm2 = vcmask 64512  }
  0x28   : > { %465 = vperm.xlu0 %3451, %v461_v9   ;;  %3452 = vset.pattern.permute.xlu1 %v4893_v8  ;;  %s3933_s30 = scalar_lea.vmem [#allocation3], %s2905_s21  ;;  %v577_v29 = vld [vmem:[%s4884_s4] sm:$0xff]  ;;  %v3463_v51 = vld [vmem:[%s4883_s3 + $0x8] sm:$0xff]   ;;  %vm750_vm3 = vcmask 1043456   ;;  %vm3799_vm4 = vmmov 0   ;;  %s2906_s23 = sshll.u32 %s3921_s16, 7 }
  0x29   : > { %v451_v11 = vld [vmem:[%s3933_s30] sm:$0xff]  ;;  %v452_v12 = vld [vmem:[%s3933_s30 + $0x8] sm:$0xff]  ;;  %v453_v13 = vld [vmem:[%s3933_s30 + $0x10] sm:$0xff]  ;;  %585 = vperm.xlu1 %3452, %v577_v29   ;;  %s4804_s24 = scalar_lea.vmem [#allocation4], %s2906_s23  ;;  %s4939_s28 = sadd.s32 4294967295, %s3795_s19  }
  0x2a   : > { %v2909_v14 = vcombine.high %v451_v11, %v452_v12  ;;  %v2908_v15 = vcombine.low %v451_v11, %v452_v12  ;;  %v454_v16 = vld [vmem:[%s3933_s30 + $0x18] sm:$0xff]  ;;  %v455_v18 = vld [vmem:[%s3933_s30 + $0x20] sm:$0xff]  ;;  %v456_v19 = vld [vmem:[%s3933_s30 + $0x28] sm:$0xff]  ;;  %s3001_s29 = sshll.u32 %s4939_s28, 8  ;;  %s2830_s12 = sshll.u32 %s4804_s24, 4  ;;  %s4833_s12 = int_to_ptr.vmem [resolvable:$true] %s2830_s12 }
  0x2b   : > { %v2911_v17 = vcombine.high %v453_v13, %v454_v16  ;;  %v2910_v21 = vcombine.low %v453_v13, %v454_v16  ;;  %v457_v22 = vld [vmem:[%s3933_s30 + $0x30] sm:$0xff]  ;;  %v458_v23 = vld [vmem:[%s3933_s30 + $0x38] sm:$0xff]  ;;  %v2913_v24 = vcombine.high %v455_v18, %v456_v19  ;;  %v2912_v25 = vcombine.low %v455_v18, %v456_v19  ;;  %v701_v30 = vld [vmem:[%s4885_s5] sm:$0xf]  ;;  %s4830_s14 = scalar_lea.hbm %s4891_s11, %s3001_s29  ;;  %s3733_s20 = scalar_lea.vmem %s4833_s12, 2048 }
  0x2c   : > { %522 = vmatprep.subr.bf16.mxu1 %v2909_v14  ;;  %470 = vperm.xlu0 %3451, %v462_v10   ;;  %v2915_v26 = vcombine.high %v457_v22, %v458_v23  ;;  %v2914_v27 = vcombine.low %v457_v22, %v458_v23  ;;  %v581_v32 = vld [vmem:[%s4884_s4 + $0x20] sm:$0xff]  ;;  %p3734_p13 = scmp.ne.s32.totalorder %s4833_s12, %s3733_s20  ;;  %s3800_s21 = smov [#allocation4]  }
  0x2d   : > { %523 = vmatpush1.bf16.msra.mxu1 %v2908_v15  ;;  %600 = vperm.xlu1 %3452, %v580_v31   ;;  %v702_v33 = vld [vmem:[%s4885_s5 + $0x4] sm:$0xf]  ;;  %s3737_s23 = sshll.u32 %s3800_s21, 4  ;;  %s3738_s23 = int_to_ptr.vmem [resolvable:$false] %s3737_s23 }
  0x2e   : > { %524 = vmatprep.subr.bf16.mxu1 %v2911_v17  ;;  %v3462_v50 = vld [vmem:[%s4883_s3] sm:$0xff]   ;;  %p3735_p0 = pnand %p3734_p13, %p3902_p6  ;;  %s3739_s28 = scalar_lea.vmem %s3738_s23, 4096 }
  0x2f   : > { %p3740_p2 = scmp.lt.s32.totalorder %s4833_s12, %s3738_s23  ;;  %p3741_p3 = scmp.lt.s32.totalorder %s3739_s28, %s3733_s20 }
  0x30   : > { %590 = vperm.xlu0 %3451, %v578_v20   ;;  %p3736_p1 = pneg %p3735_p0 }
  0x31   : > { %525 = vmatpush1.bf16.msra.mxu1 %v2910_v21  ;;  %605 = vperm.xlu1 %3452, %v581_v32   ;;  %p3742_p4 = por %p3741_p3, %p3740_p2 }
  0x32   : > { %526 = vmatprep.subr.bf16.mxu1 %v2913_v24 }
  0x33   : > { %p3743_p5 = pnand %p3742_p4, %p3736_p1 }
  0x35   : > { %527 = vmatpush1.bf16.msra.mxu1 %v2912_v25 }
  0x36   : > { %528 = vmatprep.subr.bf16.mxu1 %v2915_v26 }
  0x39   : > { %529 = vmatpush1.bf16.msra.mxu1 %v2914_v27 }
  0x3c   : > { %2916 = vmatmul.mubr.msk.bf16.vlgmr.msra.gmra.mrb[0].mxu1 %vm518_vm0, %v3461_v28 }
  0x3d   : > { %670 = vmatprep.mubr.bf16.mxu1 %v4893_v8 }
  0x4e   : > { %709 = vxpose.xlu0.c.b16.start.end [1/1] (short) %v701_v30, 128 }
  0x54   : > { %851 = vxpose.xlu1.c.b16.start.end [1/1] (short) %v702_v33, 128 }
  0xa7   : > { %v466_v34 = vpop.permute.xlu0 %465 }
  0xa8   : > { %v3979_v53 = vpop.permute.xlu1 %585 }
  0xab   : > { %v471_v38 = vpop.permute.xlu0 %470 }
  0xac   : > { %v3983_v55 = vpop.permute.xlu1 %600 }
  0xaf   : > { %v3981_v54 = vpop.permute.xlu0 %590 }
  0xb0   : > { %v3989_v57 = vpop.permute.xlu1 %605 }
  0xb4   : > { %v3985_v56 = vpop.trf.xlu0 }
  0xb5   : > { %3112 = vmatprep.mubr.msk.bf16.mxu0 %vm725_vm2, %v3985_v56 }
  0xb8   : > { %v3995_v59 = vpop.trf.xlu0 }
  0xba   : > { %v3991_v58 = vpop.trf.xlu1 }
  0xbc   : > { %v3997_v61 = vpop.trf.xlu0 }
  0xbd   : > { %4910 = vst [vmem:[#allocation7_spill] sm:$0xff] %v3997_v61 }
  0xbe   : > { %v4007_v6 = vpop.trf.xlu1 }
  0xbf   : > { %4911 = vst [vmem:[#allocation8_spill] sm:$0xff] %v4007_v6 }
  0xc0   : > { %v4009_v7 = vpop.trf.xlu0 }
  0xc1   : > { %4912 = vst [vmem:[#allocation9_spill] sm:$0xff] %v4009_v7 }
  0xc2   : > { %v4019_v12 = vpop.trf.xlu1 }
  0xc3   : > { %4914 = vst [vmem:[#allocation11_spill] sm:$0xff] %v4019_v12 }
  0xc4   : > { %v4026_v16 = vpop.trf.xlu0 }
  0xc5   : > { %4915 = vst [vmem:[#allocation12_spill] sm:$0xff] %v4026_v16 }
  0xc6   : > { %v4030_v19 = vpop.trf.xlu1 }
  0xc7   : > { %4916 = vst [vmem:[#allocation13_spill] sm:$0xff] %v4030_v19 }
  0xc8   : > { %v4039_v24 = vpop.trf.xlu0 }
  0xc9   : > { %4917 = vst [vmem:[#allocation14_spill] sm:$0xff] %v4039_v24 }
  0xca   : > { %v4051_v28 = vpop.trf.xlu1 }
  0xcb   : > { %4918 = vst [vmem:[#allocation15_spill] sm:$0xff] %v4051_v28 }
  0xcc   : > { %v4053_v29 = vpop.trf.xlu0 }
  0xcd   : > { %4919 = vst [vmem:[#allocation16_spill] sm:$0xff] %v4053_v29 }
  0xce   : > { %v4061_v30 = vpop.trf.xlu1 }
  0xcf   : > { %4920 = vst [vmem:[#allocation17_spill] sm:$0xff] %v4061_v30 }
  0xd0   : > { %v4065_v31 = vpop.trf.xlu0 }
  0xd1   : > { %4921 = vst [vmem:[#allocation18_spill] sm:$0xff] %v4065_v31 }
  0xd2   : > { %v4069_v32 = vpop.trf.xlu1 }
  0xd3   : > { %4922 = vst [vmem:[#allocation19_spill] sm:$0xff] %v4069_v32 }
  0xd6   : > { %v4075_v33 = vpop.trf.xlu1 }
  0xd7   : > { %4923 = vst [vmem:[#allocation20_spill] sm:$0xff] %v4075_v33 }
 0x10f   : > { %v556_v35 = vpop.f32.mrb[0].mxu1 }
 0x110   : > { %v557_v36 = vadd.f32 %v556_v35, %v466_v34  ;;  %v558_v37 = vpop.f32.mrb[1].mxu1 }
 0x111   : > { %v559_v39 = vadd.f32 %v558_v37, %v466_v34  ;;  %v560_v40 = vpop.f32.mrb[2].mxu1 }
 0x112   : > { %v561_v41 = vadd.f32 %v560_v40, %v471_v38  ;;  %v562_v42 = vpop.f32.mrb[3].mxu1  ;;  %v565_v44 = vmax.f32 %v557_v36, 0.0 }
 0x113   : > { %v563_v43 = vadd.f32 %v562_v42, %v471_v38  ;;  %v566_v46 = vmax.f32 %v559_v39, 0.0 }
 0x114   : > { %v567_v45 = vmax.f32 %v561_v41, 0.0 }
 0x115   : > { %v568_v47 = vmax.f32 %v563_v43, 0.0 }
 0x116   : > { %v575_v48 = vpack.c.bf16 %v567_v45, %v565_v44 }
 0x117   : > { %v576_v49 = vpack.c.bf16 %v568_v47, %v566_v46 }
 0x119   : > { %638 = vmatprep.subr.bf16.mxu1 %v576_v49 }
 0x11a   : > { %639 = vmatpush1.bf16.msra.mxu1 %v575_v48 }
 0x11d   : > { %2920 = vmatmul.mubr.msk.bf16.vlgmr.msra.gmra.mrb[4].mxu1 %vm628_vm1, %v3462_v50 }
 0x11e   : > { %680 = vmatprep.mubr.bf16.mxu1 %v4893_v8 }
 0x125   : > { %2921 = vmatmul.mubr.msk.bf16.gmra.mrb[8].mxu1 %vm628_vm1, %v3463_v51 }
 0x126   : > { %690 = vmatprep.mubr.bf16.mxu1 %v4893_v8 }
 0x12d   : > { %2922 = vmatmul.mubr.msk.bf16.gmra.mrb[12].mxu1 %vm628_vm1, %v3464_v52 }
 0x12e   : > { %3130 = vmatprep.mubr.msk.bf16.mxu1 %vm725_vm2, %v3991_v58 }
 0x1f0   : > { %v672_v60 = vpop.f32.mrb[4].mxu1 }
 0x1f1   : > { %v673_v62 = vadd.f32 %v672_v60, %v3979_v53  ;;  %v4000_v63 = vpop.f32.mrb[5].mxu1 }
 0x1f2   : > { %v676_v0 = vpop.f32.mrb[6].mxu1 }
 0x1f3   : > { %v703_v1 = vpack.c.bf16 %v673_v62, %v673_v62  ;;  %v677_v2 = vadd.f32 %v676_v0, %v3981_v54  ;;  %v4003_v3 = vpop.f32.mrb[7].mxu1 }
 0x1f5   : > { %v705_v4 = vpack.c.bf16 %v677_v2, %v677_v2  ;;  %991 = vxpose.xlu0.c.b16.start.end [1/1] (short) %v703_v1, 128  ;;  %3398 = vmatprep.subr.msk.bf16.mxu0 %vm750_vm3, %v703_v1  ;;  %v752_v5 = vsel %vm750_vm3, %v703_v1, 0 }
 0x1f6   : > { %3111 = vmatpush3.bf16.msra.mxu0 %v752_v5 }
 0x1f7   : > { %3400 = vmatprep.subr.msk.bf16.mxu0 %vm750_vm3, %v705_v4  ;;  %v1032_v10 = vsel %vm750_vm3, %v705_v4, 0 }
 0x1f8   : > { %v4012_v9 = vpop.f32.mrb[8].mxu1 }
 0x1f9   : > { %v4015_v11 = vpop.f32.mrb[9].mxu1  ;;  %3113 = vmatmul.mubr.msk.bf16.vlgmr.msra.gmra.mrb[0].mxu0 %vm725_vm2, %v3995_v59 }
 0x1fa   : > { %4913 = vst [vmem:[#allocation10_spill] sm:$0xff] %v4015_v11  ;;  %v686_v13 = vpop.f32.mrb[10].mxu1  ;;  %3147 = vmatpush3.bf16.msra.mxu0 %v1032_v10  ;;  %3116 = vmatprep.mubr.msk.bf16.mxu0 %vm725_vm2, %v3997_v61 }
 0x1fb   : > { %v687_v14 = vadd.f32 %v686_v13, %v3983_v55  ;;  %v4024_v15 = vpop.f32.mrb[11].mxu1 }
 0x1fd   : > { %v704_v17 = vpack.c.bf16 %v687_v14, %v687_v14 }
 0x1ff   : > { %1131 = vxpose.xlu1.c.b16.start.end [1/1] (short) %v704_v17, 128  ;;  %3399 = vmatprep.subr.msk.bf16.mxu1 %vm750_vm3, %v704_v17  ;;  %v892_v18 = vsel %vm750_vm3, %v704_v17, 0 }
 0x200   : > { %v692_v20 = vpop.f32.mrb[12].mxu1  ;;  %3129 = vmatpush3.bf16.msra.mxu1 %v892_v18 }
 0x201   : > { %v693_v21 = vadd.f32 %v692_v20, %v3989_v57  ;;  %v4033_v22 = vpop.f32.mrb[13].mxu1  ;;  %3117 = vmatmul.mubr.msk.bf16.gmra.mrb[4].mxu0 %vm725_vm2, %v4009_v7 }
 0x202   : > { %v4037_v23 = vpop.f32.mrb[14].mxu1  ;;  %3120 = vmatprep.mubr.msk.bf16.mxu0 %vm725_vm2, %v4026_v16 }
 0x203   : > { %v706_v25 = vpack.c.bf16 %v693_v21, %v693_v21  ;;  %3131 = vmatmul.mubr.msk.bf16.vlgmr.msra.gmra.mrb[16].mxu1 %vm725_vm2, %v4007_v6  ;;  %v4045_v26 = vpop.f32.mrb[15].mxu1 }
 0x204   : > { %3134 = vmatprep.mubr.msk.bf16.mxu1 %vm725_vm2, %v4019_v12 }
 0x205   : > { %v1172_v27 = vsel %vm750_vm3, %v706_v25, 0  ;;  %3401 = vmatprep.subr.msk.bf16.mxu1 %vm750_vm3, %v706_v25 }
 0x206   : > { %3165 = vmatpush3.bf16.msra.mxu1 %v1172_v27 }
 0x209   : > { %3121 = vmatmul.mubr.msk.bf16.gmra.mrb[8].mxu0 %vm725_vm2, %v4039_v24 }
 0x20a   : > { %3124 = vmatprep.mubr.msk.bf16.mxu0 %vm725_vm2, %v4053_v29 }
 0x20b   : > { %3135 = vmatmul.mubr.msk.bf16.gmra.mrb[20].mxu1 %vm725_vm2, %v4030_v19 }
 0x20c   : > { %3138 = vmatprep.mubr.msk.bf16.mxu1 %vm725_vm2, %v4051_v28 }
 0x211   : > { %3125 = vmatmul.mubr.msk.bf16.gmra.mrb[12].mxu0 %vm725_vm2, %v4065_v31 }
 0x213   : > { %3139 = vmatmul.mubr.msk.bf16.gmra.mrb[24].mxu1 %vm725_vm2, %v4061_v30 }
 0x214   : > { %3142 = vmatprep.mubr.msk.bf16.mxu1 %vm725_vm2, %v4069_v32 }
 0x21b   : > { %3143 = vmatmul.mubr.msk.bf16.gmra.mrb[28].mxu1 %vm725_vm2, %v4075_v33 }
 0x25b   : > { %v999_v34 = vpop.trf.xlu0 }
 0x25c   : > { %3148 = vmatprep.mubr.msk.bf16.mxu0 %vm725_vm2, %v999_v34 }
 0x25f   : > { %v1000_v35 = vpop.trf.xlu0 }
 0x260   : > { %3149 = vmatmul.mubr.msk.bf16.vlgmr.msra.gmra.mrb[0].mxu0 %vm725_vm2, %v1000_v35 }
 0x263   : > { %v1001_v36 = vpop.trf.xlu0 }
 0x264   : > { %3152 = vmatprep.mubr.msk.bf16.mxu0 %vm725_vm2, %v1001_v36 }
 0x265   : > { %v1139_v37 = vpop.trf.xlu1 }
 0x266   : > { %3166 = vmatprep.mubr.msk.bf16.mxu1 %vm725_vm2, %v1139_v37 }
 0x267   : > { %v1002_v38 = vpop.trf.xlu0 }
 0x268   : > { %3153 = vmatmul.mubr.msk.bf16.gmra.mrb[4].mxu0 %vm725_vm2, %v1002_v38 }
 0x269   : > { %v1140_v39 = vpop.trf.xlu1 }
 0x26a   : > { %3167 = vmatmul.mubr.msk.bf16.vlgmr.msra.gmra.mrb[16].mxu1 %vm725_vm2, %v1140_v39 }
 0x26b   : > { %v1003_v40 = vpop.trf.xlu0 }
 0x26c   : > { %3156 = vmatprep.mubr.msk.bf16.mxu0 %vm725_vm2, %v1003_v40 }
 0x26d   : > { %v1141_v41 = vpop.trf.xlu1 }
 0x26e   : > { %3170 = vmatprep.mubr.msk.bf16.mxu1 %vm725_vm2, %v1141_v41 }
 0x26f   : > { %v1004_v42 = vpop.trf.xlu0 }
 0x270   : > { %3157 = vmatmul.mubr.msk.bf16.gmra.mrb[8].mxu0 %vm725_vm2, %v1004_v42 }
 0x271   : > { %v1142_v43 = vpop.trf.xlu1 }
 0x272   : > { %3171 = vmatmul.mubr.msk.bf16.gmra.mrb[20].mxu1 %vm725_vm2, %v1142_v43 }
 0x273   : > { %v1005_v44 = vpop.trf.xlu0 }
 0x274   : > { %3160 = vmatprep.mubr.msk.bf16.mxu0 %vm725_vm2, %v1005_v44 }
 0x275   : > { %v1143_v45 = vpop.trf.xlu1 }
 0x276   : > { %3174 = vmatprep.mubr.msk.bf16.mxu1 %vm725_vm2, %v1143_v45 }
 0x277   : > { %v1006_v46 = vpop.trf.xlu0 }
 0x278   : > { %3161 = vmatmul.mubr.msk.bf16.gmra.mrb[12].mxu0 %vm725_vm2, %v1006_v46 }
 0x279   : > { %v1144_v47 = vpop.trf.xlu1 }
 0x27a   : > { %3175 = vmatmul.mubr.msk.bf16.gmra.mrb[24].mxu1 %vm725_vm2, %v1144_v47 }
 0x27d   : > { %v1145_v48 = vpop.trf.xlu1 }
 0x27e   : > { %3178 = vmatprep.mubr.msk.bf16.mxu1 %vm725_vm2, %v1145_v48 }
 0x281   : > { %v1146_v49 = vpop.trf.xlu1 }
 0x282   : > { %3179 = vmatmul.mubr.msk.bf16.gmra.mrb[28].mxu1 %vm725_vm2, %v1146_v49 }
 0x333   : > { %v4095_v50 = vpop.f32.mrb[0].mxu0 }
 0x334   : > { %v4097_v51 = vpop.f32.mrb[1].mxu0 }
 0x335   : > { %1271 = vmax.xlane.f32.xlu0 %v4097_v51  ;;  %v4100_v52 = vpop.f32.mrb[2].mxu0 }
 0x336   : > { %v4102_v60 = vpop.f32.mrb[3].mxu0 }
 0x337   : > { %1273 = vmax.xlane.f32.xlu1 %v4102_v60 }
 0x33b   : > { %1275 = vmax.xlane.f32.xlu1 %v4095_v50  ;;  %v4106_v62 = vpop.f32.mrb[4].mxu0 }
 0x33c   : > { %v4108_v0 = vpop.f32.mrb[5].mxu0 }
 0x33d   : > { %v4110_v1 = vpop.f32.mrb[6].mxu0  ;;  %v4112_v2 = vpop.f32.mrb[16].mxu1 }
 0x33e   : > { %v4114_v4 = vpop.f32.mrb[7].mxu0  ;;  %v4116_v5 = vpop.f32.mrb[17].mxu1 }
 0x33f   : > { %v4118_v10 = vpop.f32.mrb[18].mxu1  ;;  %1303 = vmax.xlane.f32.xlu0 %v4116_v5  ;;  %1307 = vmax.xlane.f32.xlu1 %v4112_v2 }
 0x340   : > { %v4122_v13 = vpop.f32.mrb[19].mxu1 }
 0x343   : > { %1305 = vmax.xlane.f32.xlu0 %v4122_v13  ;;  %1279 = vmax.xlane.f32.xlu1 %v4108_v0  ;;  %v4126_v14 = vpop.f32.mrb[8].mxu0 }
 0x344   : > { %v4128_v17 = vpop.f32.mrb[9].mxu0 }
 0x345   : > { %v4130_v18 = vpop.f32.mrb[10].mxu0  ;;  %v4132_v20 = vpop.f32.mrb[20].mxu1 }
 0x346   : > { %v4134_v21 = vpop.f32.mrb[11].mxu0  ;;  %v4136_v25 = vpop.f32.mrb[21].mxu1 }
 0x347   : > { %v4138_v27 = vpop.f32.mrb[22].mxu1  ;;  %1277 = vmax.xlane.f32.xlu0 %v4100_v52  ;;  %1311 = vmax.xlane.f32.xlu1 %v4136_v25 }
 0x348   : > { %v4142_v34 = vpop.f32.mrb[23].mxu1 }
 0x34b   : > { %1309 = vmax.xlane.f32.xlu0 %v4118_v10  ;;  %1283 = vmax.xlane.f32.xlu1 %v4106_v62  ;;  %v4146_v35 = vpop.f32.mrb[12].mxu0 }
 0x34c   : > { %v4148_v36 = vpop.f32.mrb[13].mxu0 }
 0x34d   : > { %v4150_v37 = vpop.f32.mrb[14].mxu0  ;;  %v4152_v38 = vpop.f32.mrb[24].mxu1 }
 0x34e   : > { %v4154_v39 = vpop.f32.mrb[15].mxu0  ;;  %v4156_v40 = vpop.f32.mrb[25].mxu1 }
 0x34f   : > { %v4158_v41 = vpop.f32.mrb[26].mxu1  ;;  %1315 = vmax.xlane.f32.xlu1 %v4132_v20  ;;  %1281 = vmax.xlane.f32.xlu0 %v4114_v4 }
 0x350   : > { %v4162_v42 = vpop.f32.mrb[27].mxu1 }
 0x353   : > { %1313 = vmax.xlane.f32.xlu0 %v4142_v34  ;;  %1287 = vmax.xlane.f32.xlu1 %v4128_v17 }
 0x355   : > { %v4166_v43 = vpop.f32.mrb[28].mxu1 }
 0x356   : > { %v4168_v44 = vpop.f32.mrb[29].mxu1 }
 0x357   : > { %v4170_v45 = vpop.f32.mrb[30].mxu1  ;;  %1285 = vmax.xlane.f32.xlu0 %v4110_v1  ;;  %1319 = vmax.xlane.f32.xlu1 %v4156_v40 }
 0x358   : > { %v4174_v46 = vpop.f32.mrb[31].mxu1 }
 0x35b   : > { %1317 = vmax.xlane.f32.xlu0 %v4138_v27  ;;  %1291 = vmax.xlane.f32.xlu1 %v4126_v14 }
 0x35f   : > { %1323 = vmax.xlane.f32.xlu1 %v4152_v38  ;;  %1289 = vmax.xlane.f32.xlu0 %v4134_v21 }
 0x363   : > { %1321 = vmax.xlane.f32.xlu0 %v4162_v42  ;;  %1295 = vmax.xlane.f32.xlu1 %v4148_v36 }
 0x367   : > { %1293 = vmax.xlane.f32.xlu0 %v4130_v18  ;;  %1327 = vmax.xlane.f32.xlu1 %v4168_v44 }
 0x36b   : > { %1325 = vmax.xlane.f32.xlu0 %v4158_v41  ;;  %1299 = vmax.xlane.f32.xlu1 %v4146_v35 }
 0x36f   : > { %1331 = vmax.xlane.f32.xlu1 %v4166_v43  ;;  %1297 = vmax.xlane.f32.xlu0 %v4154_v39 }
 0x373   : > { %1329 = vmax.xlane.f32.xlu0 %v4174_v46 }
 0x377   : > { %1301 = vmax.xlane.f32.xlu0 %v4150_v37 }
 0x37b   : > { %1333 = vmax.xlane.f32.xlu0 %v4170_v45 }
 0x3c2   : > { %v1272_v48 = vpop.xlane.xlu0 %1271 }
 0x3c3   : > { %v1335_v8 = vsub.f32 %v4097_v51, %v1272_v48 }
 0x3c4   : > { %v1274_v47 = vpop.xlane.xlu1 %1273 }
 0x3c5   : > { %v1367_v30 = vmul.f32 1.442695, %v1335_v8  ;;  %v1336_v7 = vsub.f32 %v4102_v60, %v1274_v47 }
 0x3c8   : > { %v1276_v49 = vpop.xlane.xlu1 %1275 }
 0x3c9   : > { %v1337_v11 = vsub.f32 %v4095_v50, %v1276_v49 }
 0x3cb   : > { %v1371_v33 = vmul.f32 1.442695, %v1337_v11 }
 0x3cc   : > { %v1304_v31 = vpop.xlane.xlu0 %1303  ;;  %v1308_v32 = vpop.xlane.xlu1 %1307 }
 0x3cd   : > { %3469 = vpow2.f32 %v1371_v33  ;;  %v1353_v29 = vsub.f32 %v4112_v2, %v1308_v32  ;;  %v1351_v24 = vsub.f32 %v4116_v5, %v1304_v31  ;;  %v1369_v32 = vmul.f32 1.442695, %v1336_v7 }
 0x3ce   : > { %3471 = vpow2.f32 %v1367_v30 }
 0x3cf   : > { %v1403_v16 = vmul.f32 1.442695, %v1353_v29  ;;  %v1399_v12 = vmul.f32 1.442695, %v1351_v24 }
 0x3d0   : > { %v1306_v28 = vpop.xlane.xlu0 %1305  ;;  %v1280_v19 = vpop.xlane.xlu1 %1279 }
 0x3d1   : > { %3473 = vpow2.f32 %v1403_v16  ;;  %v1339_v11 = vsub.f32 %v4108_v0, %v1280_v19  ;;  %v1352_v31 = vsub.f32 %v4122_v13, %v1306_v28 }
 0x3d2   : > { %3475 = vpow2.f32 %v1399_v12 }
 0x3d3   : > { %v1375_v29 = vmul.f32 1.442695, %v1339_v11  ;;  %v1401_v19 = vmul.f32 1.442695, %v1352_v31 }
 0x3d4   : > { %v1278_v6 = vpop.xlane.xlu0 %1277  ;;  %v1312_v51 = vpop.xlane.xlu1 %1311 }
 0x3d5   : > { %v1338_v50 = vsub.f32 %v4100_v52, %v1278_v6  ;;  %v1355_v0 = vsub.f32 %v4136_v25, %v1312_v51 }
 0x3d7   : > { %v4198_v8 = vpop.eup %3469  ;;  %v1373_v33 = vmul.f32 1.442695, %v1338_v50  ;;  %v1407_v11 = vmul.f32 1.442695, %v1355_v0 }
 0x3d8   : > { %v1310_v2 = vpop.xlane.xlu0 %1309  ;;  %v1284_v30 = vpop.xlane.xlu1 %1283  ;;  %1435 = vadd.xlane.f32.xlu1 %v4198_v8 }
 0x3d9   : > { %3477 = vpow2.f32 %v1373_v33  ;;  %v1341_v24 = vsub.f32 %v4106_v62, %v1284_v30  ;;  %v4203_v16 = vpop.eup %3471  ;;  %v1354_v6 = vsub.f32 %v4118_v10, %v1310_v2 }
 0x3da   : > { %3479 = vpow2.f32 %v1369_v32 }
 0x3db   : > { %3481 = vpow2.f32 %v1375_v29  ;;  %v1379_v7 = vmul.f32 1.442695, %v1341_v24  ;;  %v4208_v28 = vpop.eup %3473  ;;  %v1405_v62 = vmul.f32 1.442695, %v1354_v6 }
 0x3dc   : > { %v1316_v52 = vpop.xlane.xlu1 %1315  ;;  %v1282_v60 = vpop.xlane.xlu0 %1281  ;;  %1431 = vadd.xlane.f32.xlu1 %v4203_v16  ;;  %3483 = vpow2.f32 %v1401_v19 }
 0x3dd   : > { %v1357_v12 = vsub.f32 %v4132_v20, %v1316_v52  ;;  %3485 = vpow2.f32 %v1379_v7  ;;  %v1340_v47 = vsub.f32 %v4114_v4, %v1282_v60  ;;  %v4213_v48 = vpop.eup %3475 }
 0x3de   : > { %3487 = vpow2.f32 %v1405_v62 }
 0x3df   : > { %v1411_v10 = vmul.f32 1.442695, %v1357_v12  ;;  %v1377_v25 = vmul.f32 1.442695, %v1340_v47 }
 0x3e0   : > { %v1314_v5 = vpop.xlane.xlu0 %1313  ;;  %v1288_v13 = vpop.xlane.xlu1 %1287  ;;  %1467 = vadd.xlane.f32.xlu1 %v4208_v28 }
 0x3e1   : > { %v1343_v20 = vsub.f32 %v4128_v17, %v1288_v13  ;;  %3489 = vpow2.f32 %v1411_v10  ;;  %v1356_v31 = vsub.f32 %v4142_v34, %v1314_v5 }
 0x3e2   : > { %3491 = vpow2.f32 %v1407_v11 }
 0x3e3   : > { %v4215_v49 = vpop.eup %3477  ;;  %v1383_v2 = vmul.f32 1.442695, %v1343_v20  ;;  %3493 = vpow2.f32 %v1377_v25  ;;  %v1409_v6 = vmul.f32 1.442695, %v1356_v31 }
 0x3e4   : > { %v1286_v50 = vpop.xlane.xlu0 %1285  ;;  %v1320_v33 = vpop.xlane.xlu1 %1319  ;;  %1463 = vadd.xlane.f32.xlu1 %v4213_v48  ;;  %1437 = vadd.xlane.f32.xlu0 %v4215_v49 }
 0x3e5   : > { %v1342_v51 = vsub.f32 %v4110_v1, %v1286_v50  ;;  %v4221_v32 = vpop.eup %3479  ;;  %3495 = vpow2.f32 %v1383_v2  ;;  %v1359_v62 = vsub.f32 %v4156_v40, %v1320_v33 }
 0x3e6   : > { %v4223_v4 = vpop.eup %3481 }
 0x3e7   : > { %v1381_v29 = vmul.f32 1.442695, %v1342_v51  ;;  %v4229_v19 = vpop.eup %3483  ;;  %v1415_v20 = vmul.f32 1.442695, %v1359_v62 }
 0x3e8   : > { %v1318_v30 = vpop.xlane.xlu0 %1317  ;;  %v1292_v17 = vpop.xlane.xlu1 %1291  ;;  %1439 = vadd.xlane.f32.xlu1 %v4223_v4  ;;  %1433 = vadd.xlane.f32.xlu0 %v4221_v32 }
 0x3e9   : > { %v1345_v24 = vsub.f32 %v4126_v14, %v1292_v17  ;;  %v4231_v1 = vpop.eup %3485  ;;  %v1358_v52 = vsub.f32 %v4138_v27, %v1318_v30  ;;  %3497 = vpow2.f32 %v1381_v29 }
 0x3ea   : > { %v4237_v0 = vpop.eup %3487  ;;  %3499 = vpow2.f32 %v1409_v6 }
 0x3eb   : > { %v1387_v7 = vmul.f32 1.442695, %v1345_v24  ;;  %v4239_v14 = vpop.eup %3489  ;;  %v1413_v5 = vmul.f32 1.442695, %v1358_v52 }
 0x3ec   : > { %v1324_v34 = vpop.xlane.xlu1 %1323  ;;  %v1290_v60 = vpop.xlane.xlu0 %1289  ;;  %1443 = vadd.xlane.f32.xlu1 %v4231_v1  ;;  %1465 = vadd.xlane.f32.xlu0 %v4229_v19 }
 0x3ed   : > { %v1361_v12 = vsub.f32 %v4152_v38, %v1324_v34  ;;  %3501 = vpow2.f32 %v1387_v7  ;;  %v1344_v47 = vsub.f32 %v4134_v21, %v1290_v60  ;;  %v4245_v11 = vpop.eup %3491 }
 0x3ee   : > { %v4247_v38 = vpop.eup %3493  ;;  %3503 = vpow2.f32 %v1413_v5 }
 0x3ef   : > { %v1419_v10 = vmul.f32 1.442695, %v1361_v12  ;;  %v1385_v25 = vmul.f32 1.442695, %v1344_v47  ;;  %v4253_v31 = vpop.eup %3495 }
 0x3f0   : > { %v1322_v13 = vpop.xlane.xlu0 %1321  ;;  %1475 = vadd.xlane.f32.xlu1 %v4239_v14  ;;  %v1296_v27 = vpop.xlane.xlu1 %1295  ;;  %1469 = vadd.xlane.f32.xlu0 %v4237_v0 }
 0x3f1   : > { %v1347_v50 = vsub.f32 %v4148_v36, %v1296_v27  ;;  %3505 = vpow2.f32 %v1419_v10  ;;  %v1360_v2 = vsub.f32 %v4162_v42, %v1322_v13 }
 0x3f2   : > { %3507 = vpow2.f32 %v1415_v20 }
 0x3f3   : > { %v4255_v21 = vpop.eup %3497  ;;  %v1391_v30 = vmul.f32 1.442695, %v1347_v50  ;;  %3509 = vpow2.f32 %v1385_v25  ;;  %v1417_v52 = vmul.f32 1.442695, %v1360_v2 }
 0x3f4   : > { %v1294_v40 = vpop.xlane.xlu0 %1293  ;;  %1471 = vadd.xlane.f32.xlu1 %v4245_v11  ;;  %v1328_v33 = vpop.xlane.xlu1 %1327  ;;  %1441 = vadd.xlane.f32.xlu0 %v4247_v38 }
 0x3f5   : > { %v1346_v51 = vsub.f32 %v4130_v18, %v1294_v40  ;;  %v4261_v6 = vpop.eup %3499  ;;  %3511 = vpow2.f32 %v1391_v30  ;;  %v1363_v5 = vsub.f32 %v4168_v44, %v1328_v33  ;;  %v3798_v33 = vmov 0.0  }
 0x3f6   : > { %3182 = vmatprep.subr.bf16.mxu0 %v3798_v33  ;;  %3202 = vmatprep.subr.bf16.mxu1 %v3798_v33 }
 0x3f7   : > { %v1389_v29 = vmul.f32 1.442695, %v1346_v51  ;;  %v4263_v18 = vpop.eup %3501  ;;  %v1423_v20 = vmul.f32 1.442695, %v1363_v5  ;;  %v582_v5 = vld [vmem:[%s4884_s4 + $0x28] sm:$0xff]  ;;  %3198 = vmatprep.mubr.msk.bf16.mxu0 %vm3799_vm4, %v3798_v33  ;;  %3218 = vmatprep.mubr.msk.bf16.mxu1 %vm3799_vm4, %v3798_v33 }
 0x3f8   : > { %v1326_v17 = vpop.xlane.xlu0 %1325  ;;  %1447 = vadd.xlane.f32.xlu1 %v4253_v31  ;;  %v1300_v36 = vpop.xlane.xlu1 %1299  ;;  %1445 = vadd.xlane.f32.xlu0 %v4255_v21 }
 0x3f9   : > { %v1349_v24 = vsub.f32 %v4146_v35, %v1300_v36  ;;  %v1362_v34 = vsub.f32 %v4158_v41, %v1326_v17  ;;  %3513 = vpow2.f32 %v1389_v29  ;;  %v4269_v62 = vpop.eup %3503 }
 0x3fa   : > { %3515 = vpow2.f32 %v1417_v52 }
 0x3fb   : > { %v1395_v7 = vmul.f32 1.442695, %v1349_v24  ;;  %v4271_v35 = vpop.eup %3505  ;;  %v1421_v13 = vmul.f32 1.442695, %v1362_v34 }
 0x3fc   : > { %1451 = vadd.xlane.f32.xlu1 %v4263_v18  ;;  %v1332_v42 = vpop.xlane.xlu1 %1331  ;;  %1473 = vadd.xlane.f32.xlu0 %v4261_v6  ;;  %v1298_v60 = vpop.xlane.xlu0 %1297 }
 0x3fd   : > { %v1365_v12 = vsub.f32 %v4166_v43, %v1332_v42  ;;  %3517 = vpow2.f32 %v1395_v7  ;;  %v1348_v10 = vsub.f32 %v4154_v39, %v1298_v60  ;;  %v4277_v47 = vpop.eup %3507 }
 0x3fe   : > { %v4279_v43 = vpop.eup %3509  ;;  %3519 = vpow2.f32 %v1421_v13  ;;  %v675_v13 = vadd.f32 %v4000_v63, %v3979_v53 }
 0x3ff   : > { %v1427_v27 = vmul.f32 1.442695, %v1365_v12  ;;  %v1393_v50 = vmul.f32 1.442695, %v1348_v10  ;;  %v4286_v39 = vpop.eup %3511  ;;  %v579_v12 = vld [vmem:[%s4884_s4 + $0x10] sm:$0xff] }
 0x400   : > { %1483 = vadd.xlane.f32.xlu1 %v4271_v35  ;;  %1477 = vadd.xlane.f32.xlu0 %v4269_v62  ;;  %v1330_v41 = vpop.xlane.xlu0 %1329 }
 0x401   : > { %3521 = vpow2.f32 %v1427_v27  ;;  %v1364_v51 = vsub.f32 %v4174_v46, %v1330_v41  ;;  %v4333_v41 = vpack.c.bf16 %v675_v13, %v675_v13  ;;  %v689_v27 = vadd.f32 %v4024_v15, %v3983_v55 }
 0x402   : > { %3523 = vpow2.f32 %v1423_v20 }
 0x403   : > { %v4288_v25 = vpop.eup %3513  ;;  %3525 = vpow2.f32 %v1393_v50  ;;  %v1425_v36 = vmul.f32 1.442695, %v1364_v51  ;;  %v4338_v10 = vpack.c.bf16 %v689_v27, %v689_v27 }
 0x404   : > { %1479 = vadd.xlane.f32.xlu1 %v4277_v47  ;;  %1449 = vadd.xlane.f32.xlu0 %v4279_v43  ;;  %v1302_v44 = vpop.xlane.xlu0 %1301  ;;  %v4293_v30 = vpop.eup %3515 }
 0x405   : > { %v1350_v40 = vsub.f32 %v4150_v37, %v1302_v44 }
 0x407   : > { %v1397_v2 = vmul.f32 1.442695, %v1350_v40  ;;  %v4295_v17 = vpop.eup %3517 }
 0x408   : > { %1455 = vadd.xlane.f32.xlu1 %v4286_v39  ;;  %1453 = vadd.xlane.f32.xlu0 %v4288_v25  ;;  %v1334_v37 = vpop.xlane.xlu0 %1333  ;;  %v4300_v24 = vpop.eup %3519 }
 0x409   : > { %3527 = vpow2.f32 %v1397_v2  ;;  %v1366_v29 = vsub.f32 %v4170_v45, %v1334_v37 }
 0x40a   : > { %3529 = vpow2.f32 %v1425_v36 }
 0x40b   : > { %v4302_v52 = vpop.eup %3521  ;;  %v1429_v46 = vmul.f32 1.442695, %v1366_v29 }
 0x40c   : > { %1459 = vadd.xlane.f32.xlu1 %v4295_v17  ;;  %1481 = vadd.xlane.f32.xlu0 %v4293_v30  ;;  %v4306_v34 = vpop.eup %3523 }
 0x40d   : > { %v4308_v42 = vpop.eup %3525  ;;  %3531 = vpow2.f32 %v1429_v46 }
 0x410   : > { %1491 = vadd.xlane.f32.xlu1 %v4302_v52  ;;  %1485 = vadd.xlane.f32.xlu0 %v4300_v24 }
 0x413   : > { %v4312_v45 = vpop.eup %3527 }
 0x414   : > { %1487 = vadd.xlane.f32.xlu1 %v4306_v34  ;;  %1457 = vadd.xlane.f32.xlu0 %v4308_v42  ;;  %v4315_v60 = vpop.eup %3529 }
 0x417   : > { %v4318_v7 = vpop.eup %3531 }
 0x418   : > { %1461 = vadd.xlane.f32.xlu0 %v4312_v45 }
 0x41c   : > { %1489 = vadd.xlane.f32.xlu0 %v4315_v60 }
 0x420   : > { %1493 = vadd.xlane.f32.xlu0 %v4318_v7 }
 0x425   : > { %595 = vperm.xlu1 %3452, %v579_v12  }
 0x436   : > { %610 = vperm.xlu0 %3451, %v582_v5  }
 0x448   : > { %1893 = vxpose.xlu1.c.b16.start.end [1/1] (short) %v4333_v41, 128 }
 0x454   : > { %2033 = vxpose.xlu0.c.b16.start.end [1/1] (short) %v4338_v10, 128 }
 0x465   : > { %v1436_v20 = vpop.xlane.xlu1 %1435 }
 0x469   : > { %v1432_v53 = vpop.xlane.xlu1 %1431 }
 0x46a   : > { %3533 = vrcp.f32 %v1432_v53 }
 0x46d   : > { %v1468_v63 = vpop.xlane.xlu1 %1467 }
 0x471   : > { %v1464_v44 = vpop.xlane.xlu1 %1463  ;;  %v1438_v50 = vpop.xlane.xlu0 %1437 }
 0x474   : > { %v3534_v36 = vpop.eup %3533 }
 0x475   : > { %v1440_v40 = vpop.xlane.xlu1 %1439  ;;  %v1434_v51 = vpop.xlane.xlu0 %1433  ;;  %v1527_v5 = vmul.f32 %v3534_v36, %v4203_v16 }
 0x476   : > { %3535 = vrcp.f32 %v1434_v51 }
 0x477   : > { %3537 = vrcp.f32 %v1464_v44 }
 0x478   : > { %3539 = vrcp.f32 %v1438_v50 }
 0x479   : > { %v1444_v2 = vpop.xlane.xlu1 %1443  ;;  %v1466_v37 = vpop.xlane.xlu0 %1465 }
 0x47a   : > { %3541 = vrcp.f32 %v1466_v37 }
 0x47b   : > { %3543 = vrcp.f32 %v1436_v20 }
 0x47d   : > { %v1476_v55 = vpop.xlane.xlu1 %1475  ;;  %v1470_v15 = vpop.xlane.xlu0 %1469 }
 0x47e   : > { %3545 = vrcp.f32 %v1470_v15 }
 0x47f   : > { %3547 = vrcp.f32 %v1468_v63 }
 0x480   : > { %v3536_v29 = vpop.eup %3535 }
 0x481   : > { %v1472_v46 = vpop.xlane.xlu1 %1471  ;;  %v1442_v12 = vpop.xlane.xlu0 %1441  ;;  %v1528_v13 = vmul.f32 %v3536_v29, %v4221_v32 }
 0x482   : > { %v3538_v27 = vpop.eup %3537  ;;  %3549 = vrcp.f32 %v1442_v12 }
 0x483   : > { %v3540_v53 = vpop.eup %3539  ;;  %v1559_v44 = vpack.c.bf16 %v1528_v13, %v1527_v5  ;;  %3551 = vrcp.f32 %v1440_v40  ;;  %v1543_v37 = vmul.f32 %v3538_v27, %v4213_v48 }
 0x484   : > { %v3542_v51 = vpop.eup %3541  ;;  %v1530_v16 = vmul.f32 %v3540_v53, %v4215_v49  ;;  %3553 = vrcp.f32 %v1472_v46 }
 0x485   : > { %v1448_v50 = vpop.xlane.xlu1 %1447  ;;  %v1446_v20 = vpop.xlane.xlu0 %1445  ;;  %3183 = vmatpush3.bf16.xpose.msra.mxu0 %v1559_v44  ;;  %v1544_v15 = vmul.f32 %v3542_v51, %v4229_v19 }
 0x486   : > { %v3544_v63 = vpop.eup %3543  ;;  %3184 = vmatprep.subr.bf16.mxu0 %v3798_v33  ;;  %3555 = vrcp.f32 %v1446_v20 }
 0x487   : > { %v1567_v61 = vpack.c.bf16 %v1544_v15, %v1543_v37  ;;  %v1529_v40 = vmul.f32 %v3544_v63, %v4198_v8 }
 0x488   : > { %v3546_v32 = vpop.eup %3545 }
 0x489   : > { %v1452_v36 = vpop.xlane.xlu1 %1451  ;;  %v1474_v29 = vpop.xlane.xlu0 %1473  ;;  %3203 = vmatpush3.bf16.xpose.msra.mxu1 %v1567_v61  ;;  %v1560_v48 = vpack.c.bf16 %v1530_v16, %v1529_v40  ;;  %v1546_v19 = vmul.f32 %v3546_v32, %v4237_v0 }
 0x48a   : > { %v3548_v12 = vpop.eup %3547  ;;  %3557 = vrcp.f32 %v1474_v29  ;;  %3204 = vmatprep.subr.bf16.mxu1 %v3798_v33 }
 0x48b   : > { %3559 = vrcp.f32 %v1444_v2  ;;  %v1545_v49 = vmul.f32 %v3548_v12, %v4208_v28 }
 0x48c   : > { %v3550_v5 = vpop.eup %3549 }
 0x48d   : > { %v1484_v13 = vpop.xlane.xlu1 %1483  ;;  %v1478_v27 = vpop.xlane.xlu0 %1477  ;;  %3185 = vmatpush3.bf16.xpose.msra.mxu0 %v1560_v48  ;;  %v1568_v61 = vpack.c.bf16 %v1546_v19, %v1545_v49  ;;  %v1532_v8 = vmul.f32 %v3550_v5, %v4247_v38 }
 0x48e   : > { %v3552_v46 = vpop.eup %3551  ;;  %3561 = vrcp.f32 %v1478_v27  ;;  %3186 = vmatprep.subr.bf16.mxu0 %v3798_v33 }
 0x48f   : > { %3563 = vrcp.f32 %v1476_v55  ;;  %v1531_v0 = vmul.f32 %v3552_v46, %v4223_v4  ;;  %v3554_v51 = vpop.eup %3553 }
 0x490   : > { %v3556_v2 = vpop.eup %3555  ;;  %v1547_v63 = vmul.f32 %v3554_v51, %v4245_v11 }
 0x491   : > { %v1480_v53 = vpop.xlane.xlu1 %1479  ;;  %v1450_v44 = vpop.xlane.xlu0 %1449  ;;  %3205 = vmatpush3.bf16.xpose.msra.mxu1 %v1568_v61  ;;  %v1561_v20 = vpack.c.bf16 %v1532_v8, %v1531_v0  ;;  %v1534_v4 = vmul.f32 %v3556_v2, %v4255_v21 }
 0x492   : > { %3565 = vrcp.f32 %v1450_v44  ;;  %3206 = vmatprep.subr.bf16.mxu1 %v3798_v33 }
 0x493   : > { %3567 = vrcp.f32 %v1448_v50 }
 0x494   : > { %v3558_v28 = vpop.eup %3557  ;;  %3569 = vrcp.f32 %v1480_v53 }
 0x495   : > { %v1456_v37 = vpop.xlane.xlu1 %1455  ;;  %v1454_v15 = vpop.xlane.xlu0 %1453  ;;  %3187 = vmatpush3.bf16.xpose.msra.mxu0 %v1561_v20  ;;  %v1548_v38 = vmul.f32 %v3558_v28, %v4261_v6 }
 0x496   : > { %v3560_v55 = vpop.eup %3559  ;;  %3188 = vmatprep.subr.bf16.mxu0 %v3798_v33  ;;  %3571 = vrcp.f32 %v1454_v15 }
 0x497   : > { %v1569_v16 = vpack.c.bf16 %v1548_v38, %v1547_v63  ;;  %v1533_v50 = vmul.f32 %v3560_v55, %v4231_v1 }
 0x498   : > { %v3562_v32 = vpop.eup %3561 }
 0x499   : > { %v1460_v29 = vpop.xlane.xlu1 %1459  ;;  %v1482_v40 = vpop.xlane.xlu0 %1481  ;;  %3207 = vmatpush3.bf16.xpose.msra.mxu1 %v1569_v16  ;;  %v1562_v11 = vpack.c.bf16 %v1534_v4, %v1533_v50  ;;  %v1550_v6 = vmul.f32 %v3562_v32, %v4269_v62 }
 0x49a   : > { %v3564_v12 = vpop.eup %3563  ;;  %3573 = vrcp.f32 %v1482_v40  ;;  %3208 = vmatprep.subr.bf16.mxu1 %v3798_v33 }
 0x49b   : > { %3575 = vrcp.f32 %v1452_v36  ;;  %v1549_v21 = vmul.f32 %v3564_v12, %v4239_v14 }
 0x49c   : > { %v3566_v48 = vpop.eup %3565 }
 0x49d   : > { %v1486_v19 = vpop.xlane.xlu0 %1485  ;;  %3189 = vmatpush3.bf16.xpose.msra.mxu0 %v1562_v11  ;;  %v3568_v5 = vpop.eup %3567  ;;  %v1570_v49 = vpack.c.bf16 %v1550_v6, %v1549_v21  ;;  %v1536_v1 = vmul.f32 %v3566_v48, %v4279_v43 }
 0x49e   : > { %v1492_v27 = vpop.xlane.xlu1 %1491  ;;  %3577 = vrcp.f32 %v1486_v19  ;;  %3190 = vmatprep.subr.bf16.mxu0 %v3798_v33  ;;  %v1535_v61 = vmul.f32 %v3568_v5, %v4253_v31  ;;  %v3570_v62 = vpop.eup %3569 }
 0x49f   : > { %3579 = vrcp.f32 %v1484_v13  ;;  %v1551_v0 = vmul.f32 %v3570_v62, %v4277_v47 }
 0x4a0   : > { %v3572_v36 = vpop.eup %3571  ;;  %v1563_v8 = vpack.c.bf16 %v1536_v1, %v1535_v61  ;;  %v4930_v61 = vld [vmem:[#allocation15_spill] sm:$0xff] }
 0x4a1   : > { %v1458_v46 = vpop.xlane.xlu0 %1457  ;;  %3209 = vmatpush3.bf16.xpose.msra.mxu1 %v1570_v49  ;;  %v1538_v51 = vmul.f32 %v3572_v36, %v4288_v25  ;;  %v4931_v36 = vld [vmem:[#allocation14_spill] sm:$0xff] }
 0x4a2   : > { %3581 = vrcp.f32 %v1458_v46  ;;  %3210 = vmatprep.subr.bf16.mxu1 %v3798_v33  ;;  %v1488_v53 = vpop.xlane.xlu1 %1487  ;;  %v4929_v46 = vld [vmem:[#allocation13_spill] sm:$0xff] }
 0x4a3   : > { %3583 = vrcp.f32 %v1456_v37 }
 0x4a4   : > { %v3574_v14 = vpop.eup %3573  ;;  %3585 = vrcp.f32 %v1488_v53  ;;  %v4933_v53 = vld [vmem:[#allocation17_spill] sm:$0xff] }
 0x4a5   : > { %v1462_v44 = vpop.xlane.xlu0 %1461  ;;  %3191 = vmatpush3.bf16.xpose.msra.mxu0 %v1563_v8  ;;  %v1552_v43 = vmul.f32 %v3574_v14, %v4293_v30  ;;  %v3576_v13 = vpop.eup %3575  ;;  %v4932_v8 = vld [vmem:[#allocation16_spill] sm:$0xff] }
 0x4a6   : > { %3192 = vmatprep.subr.bf16.mxu0 %v3798_v33  ;;  %v1537_v28 = vmul.f32 %v3576_v13, %v4263_v18  ;;  %v4935_v13 = vld [vmem:[#allocation18_spill] sm:$0xff] }
 0x4a7   : > { %v1571_v31 = vpack.c.bf16 %v1552_v43, %v1551_v0 }
 0x4a8   : > { %v3578_v2 = vpop.eup %3577  ;;  %v1564_v47 = vpack.c.bf16 %v1538_v51, %v1537_v28  ;;  %v4936_v51 = vld [vmem:[#allocation20_spill] sm:$0xff] }
 0x4a9   : > { %v1490_v20 = vpop.xlane.xlu0 %1489  ;;  %3211 = vmatpush3.bf16.xpose.msra.mxu1 %v1571_v31  ;;  %v3580_v37 = vpop.eup %3579  ;;  %v1554_v30 = vmul.f32 %v3578_v2, %v4300_v24 }
 0x4aa   : > { %3587 = vrcp.f32 %v1490_v20  ;;  %3212 = vmatprep.subr.bf16.mxu1 %v3798_v33  ;;  %v1553_v38 = vmul.f32 %v3580_v37, %v4271_v35 }
 0x4ab   : > { %3589 = vrcp.f32 %v1462_v44  ;;  %v4934_v44 = vld [vmem:[#allocation19_spill] sm:$0xff] }
 0x4ac   : > { %v3582_v15 = vpop.eup %3581  ;;  %3591 = vrcp.f32 %v1460_v29  ;;  %v1572_v55 = vpack.c.bf16 %v1554_v30, %v1553_v38 }
 0x4ad   : > { %v1494_v63 = vpop.xlane.xlu0 %1493  ;;  %3193 = vmatpush3.bf16.xpose.msra.mxu0 %v1564_v47  ;;  %v3584_v25 = vpop.eup %3583  ;;  %v1540_v18 = vmul.f32 %v3582_v15, %v4308_v42 }
 0x4ae   : > { %3593 = vrcp.f32 %v1494_v63  ;;  %3194 = vmatprep.subr.bf16.mxu0 %v3798_v33  ;;  %v3586_v16 = vpop.eup %3585  ;;  %v1539_v4 = vmul.f32 %v3584_v25, %v4286_v39 }
 0x4af   : > { %3595 = vrcp.f32 %v1492_v27  ;;  %v1555_v35 = vmul.f32 %v3586_v16, %v4306_v34  ;;  %v4388_v34 = vpop.permute.xlu1 %595 }
 0x4b0   : > { %v1565_v32 = vpack.c.bf16 %v1540_v18, %v1539_v4  ;;  %v683_v5 = vadd.f32 %v4012_v9, %v4388_v34  ;;  %v1694_v9 = vsel %vm750_vm3, %v4333_v41, 0 }
 0x4b1   : > { %3213 = vmatpush3.bf16.xpose.msra.mxu1 %v1572_v55 }
 0x4b2   : > { %3214 = vmatprep.subr.bf16.mxu1 %v3798_v33  ;;  %v707_v27 = vpack.c.bf16 %v683_v5, %v683_v5 }
 0x4b3   : > { %v1901_v1 = vpop.trf.xlu1 }
 0x4b4   : > { %v3588_v24 = vpop.eup %3587 }
 0x4b5   : > { %v3590_v29 = vpop.eup %3589  ;;  %v611_v40 = vpop.permute.xlu0 %610  ;;  %v1556_v50 = vmul.f32 %v3588_v24, %v4315_v60  ;;  %3195 = vmatpush3.bf16.xpose.msra.mxu0 %v1565_v32 }
 0x4b6   : > { %v4382_v12 = vadd.f32 %v4045_v26, %v611_v40  ;;  %v3592_v42 = vpop.eup %3591  ;;  %3196 = vmatprep.subr.bf16.mxu0 %v3798_v33  ;;  %v1542_v39 = vmul.f32 %v3590_v29, %v4312_v45  ;;  %v697_v49 = vadd.f32 %v4037_v23, %v611_v40  ;;  %v1794_v23 = vsel %vm750_vm3, %v4338_v10, 0 }
 0x4b7   : > { %v1573_v11 = vpack.c.bf16 %v1556_v50, %v1555_v35  ;;  %v1541_v48 = vmul.f32 %v3592_v42, %v4295_v17  ;;  %v679_v17 = vadd.f32 %v4003_v3, %v3981_v54  ;;  %v1902_v14 = vpop.trf.xlu1 }
 0x4b8   : > { %v3594_v6 = vpop.eup %3593  ;;  %v708_v54 = vpack.c.bf16 %v697_v49, %v697_v49 }
 0x4b9   : > { %3215 = vmatpush3.bf16.xpose.msra.mxu1 %v1573_v11  ;;  %v3596_v19 = vpop.eup %3595  ;;  %v1566_v60 = vpack.c.bf16 %v1542_v39, %v1541_v48  ;;  %v1558_v21 = vmul.f32 %v3594_v6, %v4318_v7  ;;  %v1689_v7 = vpack.c.bf16 %v679_v17, %v679_v17 }
 0x4ba   : > { %3216 = vmatprep.subr.bf16.mxu1 %v3798_v33  ;;  %v1557_v26 = vmul.f32 %v3596_v19, %v4302_v52  ;;  %v695_v52 = vadd.f32 %v4033_v22, %v3989_v57  ;;  %v2041_v62 = vpop.trf.xlu0 }
 0x4bb   : > { %v1934_v57 = vsel %vm750_vm3, %v1689_v7, 0  ;;  %v1903_v43 = vpop.trf.xlu1 }
 0x4bc   : > { %v1574_v45 = vpack.c.bf16 %v1558_v21, %v1557_v26  ;;  %v1690_v3 = vpack.c.bf16 %v695_v52, %v695_v52 }
 0x4bd   : > { %3197 = vmatpush3.bf16.xpose.msra.mxu0 %v1566_v60 }
 0x4be   : > { %3402 = vmatprep.subr.msk.bf16.mxu0 %vm750_vm3, %v4333_v41  ;;  %v2074_v22 = vsel %vm750_vm3, %v1690_v3, 0  ;;  %v4925_v41 = vld [vmem:[#allocation8_spill] sm:$0xff]  ;;  %v2042_v0 = vpop.trf.xlu0 }
 0x4bf   : > { %v1904_v2 = vpop.trf.xlu1 }
 0x4c1   : > { %3217 = vmatpush3.bf16.xpose.msra.mxu1 %v1574_v45 }
 0x4c2   : > { %3403 = vmatprep.subr.msk.bf16.mxu1 %vm750_vm3, %v4338_v10  ;;  %v4927_v10 = vld [vmem:[#allocation9_spill] sm:$0xff]  ;;  %v2043_v31 = vpop.trf.xlu0 }
 0x4c3   : > { %v1905_v28 = vpop.trf.xlu1 }
 0x4c4   : > { %3199 = vmatmul.mubr.bf16.vlgmr.msra.gmra.mrb[16].mxu0 %v707_v27 }
 0x4c5   : > { %3223 = vmatpush3.bf16.msra.mxu0 %v1694_v9  ;;  %3224 = vmatprep.mubr.msk.bf16.mxu0 %vm725_vm2, %v3985_v56  ;;  %v4924_v56 = vld [vmem:[#allocation7_spill] sm:$0xff] }
 0x4c6   : > { %3404 = vmatprep.subr.msk.bf16.mxu0 %vm750_vm3, %v1689_v7  ;;  %v2044_v20 = vpop.trf.xlu0 }
 0x4c7   : > { %v1906_v47 = vpop.trf.xlu1 }
 0x4c8   : > { %3219 = vmatmul.mubr.bf16.vlgmr.msra.gmra.mrb[32].mxu1 %v708_v54 }
 0x4c9   : > { %3241 = vmatpush3.bf16.msra.mxu1 %v1794_v23  ;;  %3242 = vmatprep.mubr.msk.bf16.mxu1 %vm725_vm2, %v3991_v58  ;;  %v4926_v58 = vld [vmem:[#allocation11_spill] sm:$0xff] }
 0x4ca   : > { %3405 = vmatprep.subr.msk.bf16.mxu1 %vm750_vm3, %v1690_v3  ;;  %v2045_v37 = vpop.trf.xlu0 }
 0x4cb   : > { %v1907_v15 = vpop.trf.xlu1 }
 0x4cc   : > { %3225 = vmatmul.mubr.msk.bf16.vlgmr.msra.gmra.mrb[20].mxu0 %vm725_vm2, %v3995_v59  ;;  %v4928_v59 = vld [vmem:[#allocation12_spill] sm:$0xff] }
 0x4cd   : > { %3259 = vmatpush3.bf16.msra.mxu0 %v1934_v57  ;;  %3228 = vmatprep.mubr.msk.bf16.mxu0 %vm725_vm2, %v4924_v56 }
 0x4ce   : > { %3294 = vmatprep.subr.bf16.mxu0 %v3798_v33  ;;  %v2046_v30 = vpop.trf.xlu0 }
 0x4cf   : > { %v1908_v38 = vpop.trf.xlu1 }
 0x4d0   : > { %3243 = vmatmul.mubr.msk.bf16.vlgmr.msra.gmra.mrb[36].mxu1 %vm725_vm2, %v4925_v41 }
 0x4d1   : > { %3277 = vmatpush3.bf16.msra.mxu1 %v2074_v22  ;;  %3246 = vmatprep.mubr.msk.bf16.mxu1 %vm725_vm2, %v4926_v58 }
 0x4d2   : > { %3314 = vmatprep.subr.bf16.mxu1 %v3798_v33  ;;  %v2047_v63 = vpop.trf.xlu0 }
 0x4d4   : > { %3229 = vmatmul.mubr.msk.bf16.gmra.mrb[24].mxu0 %vm725_vm2, %v4927_v10 }
 0x4d5   : > { %3232 = vmatprep.mubr.msk.bf16.mxu0 %vm725_vm2, %v4928_v59 }
 0x4d6   : > { %v2048_v25 = vpop.trf.xlu0 }
 0x4d8   : > { %3247 = vmatmul.mubr.msk.bf16.gmra.mrb[40].mxu1 %vm725_vm2, %v4929_v46 }
 0x4d9   : > { %3250 = vmatprep.mubr.msk.bf16.mxu1 %vm725_vm2, %v4930_v61 }
 0x4dc   : > { %3233 = vmatmul.mubr.msk.bf16.gmra.mrb[28].mxu0 %vm725_vm2, %v4931_v36 }
 0x4dd   : > { %3236 = vmatprep.mubr.msk.bf16.mxu0 %vm725_vm2, %v4932_v8 }
 0x4e0   : > { %3251 = vmatmul.mubr.msk.bf16.gmra.mrb[44].mxu1 %vm725_vm2, %v4933_v53 }
 0x4e1   : > { %3254 = vmatprep.mubr.msk.bf16.mxu1 %vm725_vm2, %v4934_v44 }
 0x4e4   : > { %3237 = vmatmul.mubr.msk.bf16.gmra.mrb[32].mxu0 %vm725_vm2, %v4935_v13 }
 0x4e5   : > { %3260 = vmatprep.mubr.msk.bf16.mxu0 %vm725_vm2, %v1901_v1 }
 0x4e8   : > { %3255 = vmatmul.mubr.msk.bf16.gmra.mrb[48].mxu1 %vm725_vm2, %v4936_v51 }
 0x4e9   : > { %3278 = vmatprep.mubr.msk.bf16.mxu1 %vm725_vm2, %v2041_v62 }
 0x4ec   : > { %3261 = vmatmul.mubr.msk.bf16.vlgmr.msra.gmra.mrb[20].mxu0 %vm725_vm2, %v1902_v14 }
 0x4ed   : > { %3264 = vmatprep.mubr.msk.bf16.mxu0 %vm725_vm2, %v1903_v43 }
 0x4f0   : > { %3279 = vmatmul.mubr.msk.bf16.vlgmr.msra.gmra.mrb[36].mxu1 %vm725_vm2, %v2042_v0 }
 0x4f1   : > { %3282 = vmatprep.mubr.msk.bf16.mxu1 %vm725_vm2, %v2043_v31 }
 0x4f4   : > { %3265 = vmatmul.mubr.msk.bf16.gmra.mrb[24].mxu0 %vm725_vm2, %v1904_v2 }
 0x4f5   : > { %3268 = vmatprep.mubr.msk.bf16.mxu0 %vm725_vm2, %v1905_v28 }
 0x4f8   : > { %3283 = vmatmul.mubr.msk.bf16.gmra.mrb[40].mxu1 %vm725_vm2, %v2044_v20 }
 0x4f9   : > { %3286 = vmatprep.mubr.msk.bf16.mxu1 %vm725_vm2, %v2045_v37 }
 0x4fc   : > { %3269 = vmatmul.mubr.msk.bf16.gmra.mrb[28].mxu0 %vm725_vm2, %v1906_v47 }
 0x4fd   : > { %3272 = vmatprep.mubr.msk.bf16.mxu0 %vm725_vm2, %v1907_v15 }
 0x500   : > { %3287 = vmatmul.mubr.msk.bf16.gmra.mrb[44].mxu1 %vm725_vm2, %v2046_v30 }
 0x501   : > { %3290 = vmatprep.mubr.msk.bf16.mxu1 %vm725_vm2, %v2047_v63 }
 0x504   : > { %3273 = vmatmul.mubr.msk.bf16.gmra.mrb[32].mxu0 %vm725_vm2, %v1908_v38 }
 0x505   : > { %3310 = vmatprep.mubr.msk.bf16.mxu0 %vm3799_vm4, %v3798_v33 }
 0x508   : > { %3291 = vmatmul.mubr.msk.bf16.gmra.mrb[48].mxu1 %vm725_vm2, %v2048_v25 }
 0x509   : > { %3330 = vmatprep.mubr.msk.bf16.mxu1 %vm3799_vm4, %v3798_v33 }
 0x597   : > { %v4465_v55 = vpop.f32.mrb[16].mxu0 }
 0x598   : > { %v3200_v18 = vpop.f32.mrb[17].mxu0 }
 0x599   : > { %v1612_v16 = vpop.f32.mrb[18].mxu0 }
 0x59a   : > { %v3201_v4 = vpop.f32.mrb[19].mxu0 }
 0x59b   : > { %v4467_v24 = vpop.f32.mrb[32].mxu1 }
 0x59c   : > { %v3220_v32 = vpop.f32.mrb[33].mxu1 }
 0x59d   : > { %v1652_v29 = vpop.f32.mrb[34].mxu1 }
 0x59e   : > { %v3221_v40 = vpop.f32.mrb[35].mxu1 }
 0x5bf   : > { %v4469_v35 = vpop.f32.mrb[20].mxu0 }
 0x5c0   : > { %v4471_v50 = vpop.f32.mrb[21].mxu0 }
 0x5c1   : > { %2173 = vmax.xlane.f32.xlu1 %v4471_v50  ;;  %v4474_v42 = vpop.f32.mrb[22].mxu0 }
 0x5c2   : > { %v4476_v11 = vpop.f32.mrb[23].mxu0 }
 0x5c3   : > { %2175 = vmax.xlane.f32.xlu0 %v4476_v11  ;;  %v4479_v39 = vpop.f32.mrb[36].mxu1 }
 0x5c4   : > { %v4481_v6 = vpop.f32.mrb[37].mxu1 }
 0x5c5   : > { %2205 = vmax.xlane.f32.xlu1 %v4481_v6  ;;  %v4484_v48 = vpop.f32.mrb[38].mxu1 }
 0x5c6   : > { %v4486_v19 = vpop.f32.mrb[39].mxu1 }
 0x5c7   : > { %v4488_v60 = vpop.f32.mrb[24].mxu0  ;;  %2207 = vmax.xlane.f32.xlu0 %v4486_v19 }
 0x5c8   : > { %v4491_v21 = vpop.f32.mrb[25].mxu0 }
 0x5c9   : > { %v4493_v26 = vpop.f32.mrb[26].mxu0  ;;  %2177 = vmax.xlane.f32.xlu1 %v4469_v35 }
 0x5ca   : > { %v4496_v5 = vpop.f32.mrb[27].mxu0 }
 0x5cb   : > { %2179 = vmax.xlane.f32.xlu0 %v4474_v42  ;;  %v4499_v45 = vpop.f32.mrb[40].mxu1 }
 0x5cc   : > { %v4501_v17 = vpop.f32.mrb[41].mxu1 }
 0x5cd   : > { %2209 = vmax.xlane.f32.xlu1 %v4479_v39  ;;  %v4504_v27 = vpop.f32.mrb[42].mxu1 }
 0x5ce   : > { %v4506_v49 = vpop.f32.mrb[43].mxu1 }
 0x5cf   : > { %v4508_v7 = vpop.f32.mrb[28].mxu0  ;;  %2211 = vmax.xlane.f32.xlu0 %v4484_v48 }
 0x5d0   : > { %v4511_v52 = vpop.f32.mrb[29].mxu0 }
 0x5d1   : > { %v4513_v9 = vpop.f32.mrb[30].mxu0  ;;  %2181 = vmax.xlane.f32.xlu1 %v4491_v21 }
 0x5d2   : > { %v4516_v54 = vpop.f32.mrb[31].mxu0 }
 0x5d3   : > { %2183 = vmax.xlane.f32.xlu0 %v4496_v5  ;;  %v4519_v3 = vpop.f32.mrb[44].mxu1 }
 0x5d4   : > { %v4521_v23 = vpop.f32.mrb[45].mxu1 }
 0x5d5   : > { %2213 = vmax.xlane.f32.xlu1 %v4501_v17  ;;  %v4524_v57 = vpop.f32.mrb[46].mxu1 }
 0x5d6   : > { %v4526_v56 = vpop.f32.mrb[47].mxu1 }
 0x5d7   : > { %v4528_v22 = vpop.f32.mrb[32].mxu0  ;;  %2215 = vmax.xlane.f32.xlu0 %v4506_v49 }
 0x5d8   : > { %v4531_v41 = vpop.f32.mrb[33].mxu0 }
 0x5d9   : > { %v4533_v58 = vpop.f32.mrb[34].mxu0  ;;  %2185 = vmax.xlane.f32.xlu1 %v4488_v60 }
 0x5da   : > { %v4536_v10 = vpop.f32.mrb[35].mxu0 }
 0x5db   : > { %2187 = vmax.xlane.f32.xlu0 %v4493_v26  ;;  %v4539_v59 = vpop.f32.mrb[48].mxu1 }
 0x5dc   : > { %v4541_v1 = vpop.f32.mrb[49].mxu1 }
 0x5dd   : > { %2217 = vmax.xlane.f32.xlu1 %v4499_v45  ;;  %v4544_v46 = vpop.f32.mrb[50].mxu1 }
 0x5de   : > { %v4546_v61 = vpop.f32.mrb[51].mxu1 }
 0x5df   : > { %2219 = vmax.xlane.f32.xlu0 %v4504_v27 }
 0x5e1   : > { %2189 = vmax.xlane.f32.xlu1 %v4511_v52 }
 0x5e3   : > { %2191 = vmax.xlane.f32.xlu0 %v4516_v54 }
 0x5e5   : > { %2221 = vmax.xlane.f32.xlu1 %v4521_v23 }
 0x5e7   : > { %2223 = vmax.xlane.f32.xlu0 %v4526_v56 }
 0x5e9   : > { %2193 = vmax.xlane.f32.xlu1 %v4508_v7 }
 0x5eb   : > { %2195 = vmax.xlane.f32.xlu0 %v4513_v9 }
 0x5ed   : > { %2225 = vmax.xlane.f32.xlu1 %v4519_v3 }
 0x5ef   : > { %2227 = vmax.xlane.f32.xlu0 %v4524_v57 }
 0x5f1   : > { %2197 = vmax.xlane.f32.xlu1 %v4531_v41 }
 0x5f3   : > { %2199 = vmax.xlane.f32.xlu0 %v4536_v10 }
 0x5f5   : > { %2229 = vmax.xlane.f32.xlu1 %v4541_v1 }
 0x5f7   : > { %2231 = vmax.xlane.f32.xlu0 %v4546_v61 }
 0x5f9   : > { %2201 = vmax.xlane.f32.xlu1 %v4528_v22 }
 0x5fb   : > { %2203 = vmax.xlane.f32.xlu0 %v4533_v58 }
 0x5fd   : > { %2233 = vmax.xlane.f32.xlu1 %v4539_v59 }
 0x5ff   : > { %2235 = vmax.xlane.f32.xlu0 %v4544_v46 }
 0x64e   : > { %v2174_v62 = vpop.xlane.xlu1 %2173 }
 0x64f   : > { %v2237_v36 = vsub.f32 %v4471_v50, %v2174_v62 }
 0x650   : > { %v2176_v8 = vpop.xlane.xlu0 %2175 }
 0x651   : > { %v2269_v14 = vmul.f32 1.442695, %v2237_v36  ;;  %v2238_v53 = vsub.f32 %v4476_v11, %v2176_v8 }
 0x652   : > { %v2206_v44 = vpop.xlane.xlu1 %2205 }
 0x653   : > { %3597 = vpow2.f32 %v2269_v14  ;;  %v2271_v0 = vmul.f32 1.442695, %v2238_v53  ;;  %v2253_v43 = vsub.f32 %v4481_v6, %v2206_v44 }
 0x654   : > { %v2208_v13 = vpop.xlane.xlu0 %2207 }
 0x655   : > { %3599 = vpow2.f32 %v2271_v0  ;;  %v2301_v31 = vmul.f32 1.442695, %v2253_v43  ;;  %v2254_v51 = vsub.f32 %v4486_v19, %v2208_v13 }
 0x656   : > { %v2178_v2 = vpop.xlane.xlu1 %2177 }
 0x657   : > { %3601 = vpow2.f32 %v2301_v31  ;;  %v2303_v20 = vmul.f32 1.442695, %v2254_v51  ;;  %v2239_v28 = vsub.f32 %v4469_v35, %v2178_v2 }
 0x658   : > { %v2180_v37 = vpop.xlane.xlu0 %2179 }
 0x659   : > { %3603 = vpow2.f32 %v2303_v20  ;;  %v2273_v47 = vmul.f32 1.442695, %v2239_v28  ;;  %v2240_v30 = vsub.f32 %v4474_v42, %v2180_v37 }
 0x65a   : > { %v2210_v15 = vpop.xlane.xlu1 %2209 }
 0x65b   : > { %3605 = vpow2.f32 %v2273_v47  ;;  %v2275_v63 = vmul.f32 1.442695, %v2240_v30  ;;  %v2255_v38 = vsub.f32 %v4479_v39, %v2210_v15 }
 0x65c   : > { %v2212_v25 = vpop.xlane.xlu0 %2211 }
 0x65d   : > { %v4572_v18 = vpop.eup %3597  ;;  %3607 = vpow2.f32 %v2275_v63  ;;  %v2305_v16 = vmul.f32 1.442695, %v2255_v38  ;;  %v2256_v4 = vsub.f32 %v4484_v48, %v2212_v25 }
 0x65e   : > { %v2182_v32 = vpop.xlane.xlu1 %2181  ;;  %2333 = vadd.xlane.f32.xlu1 %v4572_v18 }
 0x65f   : > { %v4576_v29 = vpop.eup %3599  ;;  %3609 = vpow2.f32 %v2305_v16  ;;  %v2307_v40 = vmul.f32 1.442695, %v2256_v4  ;;  %v2241_v35 = vsub.f32 %v4491_v21, %v2182_v32 }
 0x660   : > { %2335 = vadd.xlane.f32.xlu0 %v4576_v29  ;;  %v2184_v50 = vpop.xlane.xlu0 %2183 }
 0x661   : > { %v4580_v42 = vpop.eup %3601  ;;  %3611 = vpow2.f32 %v2307_v40  ;;  %v2277_v11 = vmul.f32 1.442695, %v2241_v35  ;;  %v2242_v39 = vsub.f32 %v4496_v5, %v2184_v50 }
 0x662   : > { %v2214_v6 = vpop.xlane.xlu1 %2213  ;;  %2365 = vadd.xlane.f32.xlu1 %v4580_v42 }
 0x663   : > { %v4584_v48 = vpop.eup %3603  ;;  %3613 = vpow2.f32 %v2277_v11  ;;  %v2279_v19 = vmul.f32 1.442695, %v2242_v39  ;;  %v2257_v62 = vsub.f32 %v4501_v17, %v2214_v6 }
 0x664   : > { %2367 = vadd.xlane.f32.xlu0 %v4584_v48  ;;  %v2216_v21 = vpop.xlane.xlu0 %2215 }
 0x665   : > { %v4588_v36 = vpop.eup %3605  ;;  %3615 = vpow2.f32 %v2279_v19  ;;  %v2309_v8 = vmul.f32 1.442695, %v2257_v62  ;;  %v2258_v14 = vsub.f32 %v4506_v49, %v2216_v21 }
 0x666   : > { %v2186_v53 = vpop.xlane.xlu1 %2185  ;;  %2337 = vadd.xlane.f32.xlu1 %v4588_v36 }
 0x667   : > { %v4592_v5 = vpop.eup %3607  ;;  %3617 = vpow2.f32 %v2309_v8  ;;  %v2311_v44 = vmul.f32 1.442695, %v2258_v14  ;;  %v2243_v0 = vsub.f32 %v4488_v60, %v2186_v53 }
 0x668   : > { %2339 = vadd.xlane.f32.xlu0 %v4592_v5  ;;  %v2188_v17 = vpop.xlane.xlu0 %2187 }
 0x669   : > { %v4596_v43 = vpop.eup %3609  ;;  %3619 = vpow2.f32 %v2311_v44  ;;  %v2281_v13 = vmul.f32 1.442695, %v2243_v0  ;;  %v2244_v31 = vsub.f32 %v4493_v26, %v2188_v17 }
 0x66a   : > { %v2218_v51 = vpop.xlane.xlu1 %2217  ;;  %2369 = vadd.xlane.f32.xlu1 %v4596_v43 }
 0x66b   : > { %v4600_v49 = vpop.eup %3611  ;;  %3621 = vpow2.f32 %v2281_v13  ;;  %v2283_v2 = vmul.f32 1.442695, %v2244_v31  ;;  %v2259_v20 = vsub.f32 %v4499_v45, %v2218_v51 }
 0x66c   : > { %2371 = vadd.xlane.f32.xlu0 %v4600_v49  ;;  %v2220_v60 = vpop.xlane.xlu0 %2219 }
 0x66d   : > { %v4604_v28 = vpop.eup %3613  ;;  %3623 = vpow2.f32 %v2283_v2  ;;  %v2313_v37 = vmul.f32 1.442695, %v2259_v20  ;;  %v2260_v47 = vsub.f32 %v4504_v27, %v2220_v60 }
 0x66e   : > { %v2190_v30 = vpop.xlane.xlu1 %2189  ;;  %2341 = vadd.xlane.f32.xlu1 %v4604_v28 }
 0x66f   : > { %v4608_v26 = vpop.eup %3615  ;;  %3625 = vpow2.f32 %v2313_v37  ;;  %v2315_v15 = vmul.f32 1.442695, %v2260_v47  ;;  %v2245_v63 = vsub.f32 %v4511_v52, %v2190_v30 }
 0x670   : > { %2343 = vadd.xlane.f32.xlu0 %v4608_v26  ;;  %v2192_v45 = vpop.xlane.xlu0 %2191 }
 0x671   : > { %v4612_v38 = vpop.eup %3617  ;;  %3627 = vpow2.f32 %v2315_v15  ;;  %v2285_v25 = vmul.f32 1.442695, %v2245_v63  ;;  %v2246_v16 = vsub.f32 %v4516_v54, %v2192_v45 }
 0x672   : > { %v2222_v4 = vpop.xlane.xlu1 %2221  ;;  %2373 = vadd.xlane.f32.xlu1 %v4612_v38 }
 0x673   : > { %v4616_v27 = vpop.eup %3619  ;;  %3629 = vpow2.f32 %v2285_v25  ;;  %v2287_v32 = vmul.f32 1.442695, %v2246_v16  ;;  %v2261_v40 = vsub.f32 %v4521_v23, %v2222_v4 }
 0x674   : > { %2375 = vadd.xlane.f32.xlu0 %v4616_v27  ;;  %v2224_v52 = vpop.xlane.xlu0 %2223 }
 0x675   : > { %v4620_v35 = vpop.eup %3621  ;;  %3631 = vpow2.f32 %v2287_v32  ;;  %v2317_v50 = vmul.f32 1.442695, %v2261_v40  ;;  %v2262_v11 = vsub.f32 %v4526_v56, %v2224_v52 }
 0x676   : > { %v2194_v39 = vpop.xlane.xlu1 %2193  ;;  %2345 = vadd.xlane.f32.xlu1 %v4620_v35 }
 0x677   : > { %v4624_v54 = vpop.eup %3623  ;;  %3633 = vpow2.f32 %v2317_v50  ;;  %v2319_v6 = vmul.f32 1.442695, %v2262_v11  ;;  %v2247_v19 = vsub.f32 %v4508_v7, %v2194_v39 }
 0x678   : > { %2347 = vadd.xlane.f32.xlu0 %v4624_v54  ;;  %v2196_v23 = vpop.xlane.xlu0 %2195 }
 0x679   : > { %v4628_v62 = vpop.eup %3625  ;;  %3635 = vpow2.f32 %v2319_v6  ;;  %v2289_v21 = vmul.f32 1.442695, %v2247_v19  ;;  %v2248_v8 = vsub.f32 %v4513_v9, %v2196_v23 }
 0x67a   : > { %v2226_v14 = vpop.xlane.xlu1 %2225  ;;  %2377 = vadd.xlane.f32.xlu1 %v4628_v62 }
 0x67b   : > { %v4632_v56 = vpop.eup %3627  ;;  %3637 = vpow2.f32 %v2289_v21  ;;  %v2291_v53 = vmul.f32 1.442695, %v2248_v8  ;;  %v2263_v44 = vsub.f32 %v4519_v3, %v2226_v14 }
 0x67c   : > { %2379 = vadd.xlane.f32.xlu0 %v4632_v56  ;;  %v2228_v7 = vpop.xlane.xlu0 %2227 }
 0x67d   : > { %v4636_v0 = vpop.eup %3629  ;;  %3639 = vpow2.f32 %v2291_v53  ;;  %v2321_v17 = vmul.f32 1.442695, %v2263_v44  ;;  %v2264_v13 = vsub.f32 %v4524_v57, %v2228_v7 }
 0x67e   : > { %v2198_v31 = vpop.xlane.xlu1 %2197  ;;  %2349 = vadd.xlane.f32.xlu1 %v4636_v0 }
 0x67f   : > { %v4640_v9 = vpop.eup %3631  ;;  %3641 = vpow2.f32 %v2321_v17  ;;  %v2323_v51 = vmul.f32 1.442695, %v2264_v13  ;;  %v2249_v2 = vsub.f32 %v4531_v41, %v2198_v31  ;;  %v2557_v17 = vld [vmem:[%s4887_s7] sm:$0xff]  ;;  %v2558_v13 = vld [vmem:[%s4887_s7 + $0x8] sm:$0xff] }
 0x680   : > { %2351 = vadd.xlane.f32.xlu0 %v4640_v9  ;;  %v2200_v3 = vpop.xlane.xlu0 %2199  ;;  %v2571_v31 = vld [vmem:[%s4888_s8] sm:$0xff] }
 0x681   : > { %v4644_v20 = vpop.eup %3633  ;;  %3643 = vpow2.f32 %v2323_v51  ;;  %v2293_v60 = vmul.f32 1.442695, %v2249_v2  ;;  %v2250_v37 = vsub.f32 %v4536_v10, %v2200_v3  ;;  %v2572_v51 = vld [vmem:[%s4888_s8 + $0x8] sm:$0xff]  ;;  %v2599_v2 = vld [vmem:[%s4890_s10] sm:$0xff] }
 0x682   : > { %2381 = vadd.xlane.f32.xlu1 %v4644_v20  ;;  %v2230_v57 = vpop.xlane.xlu1 %2229  ;;  %v2600_v3 = vld [vmem:[%s4890_s10 + $0x8] sm:$0xff] }
 0x683   : > { %v4648_v47 = vpop.eup %3635  ;;  %3645 = vpow2.f32 %v2293_v60  ;;  %v2295_v30 = vmul.f32 1.442695, %v2250_v37  ;;  %v2265_v15 = vsub.f32 %v4541_v1, %v2230_v57  ;;  %v2601_v60 = vld [vmem:[%s4890_s10 + $0x10] sm:$0xff]  ;;  %v2602_v37 = vld [vmem:[%s4890_s10 + $0x18] sm:$0xff]  ;;  %v2603_v57 = vld [vmem:[%s4890_s10 + $0x20] sm:$0xff] }
 0x684   : > { %2383 = vadd.xlane.f32.xlu0 %v4648_v47  ;;  %v2232_v41 = vpop.xlane.xlu0 %2231 }
 0x685   : > { %v4652_v63 = vpop.eup %3637  ;;  %3647 = vpow2.f32 %v2295_v30  ;;  %v2325_v45 = vmul.f32 1.442695, %v2265_v15  ;;  %v2266_v25 = vsub.f32 %v4546_v61, %v2232_v41  ;;  %v2604_v30 = vld [vmem:[%s4890_s10 + $0x28] sm:$0xff]  ;;  %v2605_v15 = vld [vmem:[%s4890_s10 + $0x30] sm:$0xff]  ;;  %v2606_v41 = vld [vmem:[%s4890_s10 + $0x38] sm:$0xff] }
 0x686   : > { %2353 = vadd.xlane.f32.xlu1 %v4652_v63  ;;  %v2202_v10 = vpop.xlane.xlu1 %2201 }
 0x687   : > { %v4656_v16 = vpop.eup %3639  ;;  %3649 = vpow2.f32 %v2325_v45  ;;  %v2327_v4 = vmul.f32 1.442695, %v2266_v25  ;;  %v2251_v32 = vsub.f32 %v4528_v22, %v2202_v10 }
 0x688   : > { %2355 = vadd.xlane.f32.xlu0 %v4656_v16  ;;  %v2204_v1 = vpop.xlane.xlu0 %2203 }
 0x689   : > { %v4660_v40 = vpop.eup %3641  ;;  %3651 = vpow2.f32 %v2327_v4  ;;  %v2297_v52 = vmul.f32 1.442695, %v2251_v32  ;;  %v2252_v50 = vsub.f32 %v4533_v58, %v2204_v1 }
 0x68a   : > { %2385 = vadd.xlane.f32.xlu1 %v4660_v40  ;;  %v2234_v61 = vpop.xlane.xlu1 %2233 }
 0x68b   : > { %v4664_v11 = vpop.eup %3643  ;;  %3653 = vpow2.f32 %v2297_v52  ;;  %v2299_v39 = vmul.f32 1.442695, %v2252_v50  ;;  %v2267_v6 = vsub.f32 %v4539_v59, %v2234_v61 }
 0x68c   : > { %2387 = vadd.xlane.f32.xlu0 %v4664_v11  ;;  %v2236_v22 = vpop.xlane.xlu0 %2235 }
 0x68d   : > { %v4668_v19 = vpop.eup %3645  ;;  %3655 = vpow2.f32 %v2299_v39  ;;  %v2329_v23 = vmul.f32 1.442695, %v2267_v6  ;;  %v2268_v21 = vsub.f32 %v4544_v46, %v2236_v22 }
 0x68e   : > { %2357 = vadd.xlane.f32.xlu1 %v4668_v19 }
 0x68f   : > { %v4672_v58 = vpop.eup %3647  ;;  %3657 = vpow2.f32 %v2329_v23  ;;  %v2331_v8 = vmul.f32 1.442695, %v2268_v21 }
 0x690   : > { %2359 = vadd.xlane.f32.xlu0 %v4672_v58 }
 0x691   : > { %v4675_v14 = vpop.eup %3649  ;;  %3659 = vpow2.f32 %v2331_v8 }
 0x692   : > { %2389 = vadd.xlane.f32.xlu1 %v4675_v14 }
 0x693   : > { %v4678_v59 = vpop.eup %3651 }
 0x694   : > { %2391 = vadd.xlane.f32.xlu0 %v4678_v59 }
 0x695   : > { %v4681_v53 = vpop.eup %3653 }
 0x696   : > { %2361 = vadd.xlane.f32.xlu1 %v4681_v53 }
 0x697   : > { %v4684_v46 = vpop.eup %3655 }
 0x698   : > { %2363 = vadd.xlane.f32.xlu0 %v4684_v46 }
 0x699   : > { %v4687_v44 = vpop.eup %3657 }
 0x69a   : > { %2393 = vadd.xlane.f32.xlu1 %v4687_v44 }
 0x69b   : > { %v4690_v7 = vpop.eup %3659 }
 0x69c   : > { %2395 = vadd.xlane.f32.xlu0 %v4690_v7 }
 0x6ab   : > { %2561 = vperm.xlu1 %3452, %v2557_v17  }
 0x6af   : > { %1659 = vperm.xlu1 %3452, %v2557_v17  }
 0x6b2   : > { %2566 = vperm.xlu0 %3451, %v2558_v13  }
 0x6b3   : > { %1664 = vperm.xlu1 %3452, %v2558_v13  }
 0x6b6   : > { %2575 = vperm.xlu0 %3451, %v2571_v31  }
 0x6b7   : > { %2580 = vperm.xlu1 %3452, %v2572_v51  }
 0x6ba   : > { %1673 = vperm.xlu0 %3451, %v2571_v31  }
 0x6bb   : > { %1678 = vperm.xlu1 %3452, %v2572_v51  }
 0x6be   : > { %2609 = vperm.xlu0 %3451, %v2599_v2  }
 0x6bf   : > { %2614 = vperm.xlu1 %3452, %v2600_v3  }
 0x6c2   : > { %2619 = vperm.xlu0 %3451, %v2601_v60  }
 0x6c3   : > { %2624 = vperm.xlu1 %3452, %v2602_v37  }
 0x6c6   : > { %2629 = vperm.xlu0 %3451, %v2603_v57  }
 0x6c7   : > { %2634 = vperm.xlu1 %3452, %v2604_v30  }
 0x6ca   : > { %2639 = vperm.xlu0 %3451, %v2605_v15  }
 0x6cb   : > { %2644 = vperm.xlu1 %3452, %v2606_v41  }
 0x6eb   : > { %v2334_v45 = vpop.xlane.xlu1 %2333 }
 0x6ec   : > { %3661 = vrcp.f32 %v2334_v45 }
 0x6ed   : > { %v2336_v25 = vpop.xlane.xlu0 %2335 }
 0x6ee   : > { %3663 = vrcp.f32 %v2336_v25 }
 0x6ef   : > { %v2366_v10 = vpop.xlane.xlu1 %2365 }
 0x6f0   : > { %3665 = vrcp.f32 %v2366_v10 }
 0x6f1   : > { %v2368_v4 = vpop.xlane.xlu0 %2367 }
 0x6f2   : > { %3667 = vrcp.f32 %v2368_v4 }
 0x6f3   : > { %v2338_v32 = vpop.xlane.xlu1 %2337 }
 0x6f4   : > { %3669 = vrcp.f32 %v2338_v32 }
 0x6f5   : > { %v2340_v1 = vpop.xlane.xlu0 %2339 }
 0x6f6   : > { %v3662_v52 = vpop.eup %3661  ;;  %3671 = vrcp.f32 %v2340_v1 }
 0x6f7   : > { %v2370_v50 = vpop.xlane.xlu1 %2369  ;;  %v2429_v6 = vmul.f32 %v3662_v52, %v4572_v18 }
 0x6f8   : > { %v3664_v61 = vpop.eup %3663  ;;  %3673 = vrcp.f32 %v2370_v50 }
 0x6f9   : > { %v2372_v39 = vpop.xlane.xlu0 %2371  ;;  %v2430_v22 = vmul.f32 %v3664_v61, %v4576_v29 }
 0x6fa   : > { %v3666_v23 = vpop.eup %3665  ;;  %3675 = vrcp.f32 %v2372_v39 }
 0x6fb   : > { %v2342_v21 = vpop.xlane.xlu1 %2341  ;;  %v2461_v8 = vpack.c.bf16 %v2430_v22, %v2429_v6  ;;  %v2445_v31 = vmul.f32 %v3666_v23, %v4580_v42 }
 0x6fc   : > { %v3668_v17 = vpop.eup %3667  ;;  %3677 = vrcp.f32 %v2342_v21 }
 0x6fd   : > { %3295 = vmatpush3.bf16.xpose.msra.mxu0 %v2461_v8  ;;  %v2344_v13 = vpop.xlane.xlu0 %2343  ;;  %v2446_v51 = vmul.f32 %v3668_v17, %v4584_v48 }
 0x6fe   : > { %v3670_v2 = vpop.eup %3669  ;;  %3679 = vrcp.f32 %v2344_v13  ;;  %3296 = vmatprep.subr.bf16.mxu0 %v3798_v33 }
 0x6ff   : > { %v2374_v3 = vpop.xlane.xlu1 %2373  ;;  %v2469_v18 = vpack.c.bf16 %v2446_v51, %v2445_v31  ;;  %v2431_v37 = vmul.f32 %v3670_v2, %v4588_v36 }
 0x700   : > { %v3672_v60 = vpop.eup %3671  ;;  %3681 = vrcp.f32 %v2374_v3 }
 0x701   : > { %3315 = vmatpush3.bf16.xpose.msra.mxu1 %v2469_v18  ;;  %v2376_v29 = vpop.xlane.xlu0 %2375  ;;  %v2432_v57 = vmul.f32 %v3672_v60, %v4592_v5 }
 0x702   : > { %v3674_v30 = vpop.eup %3673  ;;  %3683 = vrcp.f32 %v2376_v29  ;;  %3316 = vmatprep.subr.bf16.mxu1 %v3798_v33 }
 0x703   : > { %v2346_v42 = vpop.xlane.xlu1 %2345  ;;  %v2462_v48 = vpack.c.bf16 %v2432_v57, %v2431_v37  ;;  %v2447_v45 = vmul.f32 %v3674_v30, %v4596_v43 }
 0x704   : > { %v3676_v15 = vpop.eup %3675  ;;  %3685 = vrcp.f32 %v2346_v42 }
 0x705   : > { %3297 = vmatpush3.bf16.xpose.msra.mxu0 %v2462_v48  ;;  %v2348_v41 = vpop.xlane.xlu0 %2347  ;;  %v2448_v25 = vmul.f32 %v3676_v15, %v4600_v49 }
 0x706   : > { %v3678_v10 = vpop.eup %3677  ;;  %3687 = vrcp.f32 %v2348_v41  ;;  %3298 = vmatprep.subr.bf16.mxu0 %v3798_v33 }
 0x707   : > { %v2378_v36 = vpop.xlane.xlu1 %2377  ;;  %v2470_v5 = vpack.c.bf16 %v2448_v25, %v2447_v45  ;;  %v2433_v1 = vmul.f32 %v3678_v10, %v4604_v28 }
 0x708   : > { %v3680_v4 = vpop.eup %3679  ;;  %3689 = vrcp.f32 %v2378_v36 }
 0x709   : > { %3317 = vmatpush3.bf16.xpose.msra.mxu1 %v2470_v5  ;;  %v2380_v32 = vpop.xlane.xlu0 %2379  ;;  %v2434_v52 = vmul.f32 %v3680_v4, %v4608_v26 }
 0x70a   : > { %v3682_v50 = vpop.eup %3681  ;;  %3691 = vrcp.f32 %v2380_v32  ;;  %3318 = vmatprep.subr.bf16.mxu1 %v3798_v33 }
 0x70b   : > { %v2350_v43 = vpop.xlane.xlu1 %2349  ;;  %v2463_v49 = vpack.c.bf16 %v2434_v52, %v2433_v1  ;;  %v2449_v6 = vmul.f32 %v3682_v50, %v4612_v38 }
 0x70c   : > { %v3684_v61 = vpop.eup %3683  ;;  %3693 = vrcp.f32 %v2350_v43 }
 0x70d   : > { %3299 = vmatpush3.bf16.xpose.msra.mxu0 %v2463_v49  ;;  %v2352_v39 = vpop.xlane.xlu0 %2351  ;;  %v2450_v22 = vmul.f32 %v3684_v61, %v4616_v27 }
 0x70e   : > { %v3686_v23 = vpop.eup %3685  ;;  %3695 = vrcp.f32 %v2352_v39  ;;  %3300 = vmatprep.subr.bf16.mxu0 %v3798_v33 }
 0x70f   : > { %v2382_v28 = vpop.xlane.xlu1 %2381  ;;  %v2471_v26 = vpack.c.bf16 %v2450_v22, %v2449_v6  ;;  %v2435_v17 = vmul.f32 %v3686_v23, %v4620_v35 }
 0x710   : > { %v3688_v21 = vpop.eup %3687  ;;  %3697 = vrcp.f32 %v2382_v28 }
 0x711   : > { %3319 = vmatpush3.bf16.xpose.msra.mxu1 %v2471_v26  ;;  %v2384_v8 = vpop.xlane.xlu0 %2383  ;;  %v2436_v13 = vmul.f32 %v3688_v21, %v4624_v54 }
 0x712   : > { %v3690_v31 = vpop.eup %3689  ;;  %3699 = vrcp.f32 %v2384_v8  ;;  %3320 = vmatprep.subr.bf16.mxu1 %v3798_v33 }
 0x713   : > { %v2354_v38 = vpop.xlane.xlu1 %2353  ;;  %v2464_v27 = vpack.c.bf16 %v2436_v13, %v2435_v17  ;;  %v2451_v3 = vmul.f32 %v3690_v31, %v4628_v62 }
 0x714   : > { %v3692_v51 = vpop.eup %3691  ;;  %3701 = vrcp.f32 %v2354_v38 }
 0x715   : > { %3301 = vmatpush3.bf16.xpose.msra.mxu0 %v2464_v27  ;;  %v2356_v2 = vpop.xlane.xlu0 %2355  ;;  %v2452_v18 = vmul.f32 %v3692_v51, %v4632_v56 }
 0x716   : > { %v3694_v60 = vpop.eup %3693  ;;  %3703 = vrcp.f32 %v2356_v2  ;;  %3302 = vmatprep.subr.bf16.mxu0 %v3798_v33 }
 0x717   : > { %v2386_v35 = vpop.xlane.xlu1 %2385  ;;  %v2472_v54 = vpack.c.bf16 %v2452_v18, %v2451_v3  ;;  %v2437_v57 = vmul.f32 %v3694_v60, %v4636_v0  ;;  %v4937_v60 = vld [vmem:[#allocation10_spill] sm:$0xff] }
 0x718   : > { %v3696_v29 = vpop.eup %3695  ;;  %3705 = vrcp.f32 %v2386_v35  ;;  %v685_v35 = vadd.f32 %v4937_v60, %v4388_v34 }
 0x719   : > { %3321 = vmatpush3.bf16.xpose.msra.mxu1 %v2472_v54  ;;  %v2388_v37 = vpop.xlane.xlu0 %2387  ;;  %v2438_v30 = vmul.f32 %v3696_v29, %v4640_v9 }
 0x71a   : > { %v3698_v42 = vpop.eup %3697  ;;  %3707 = vrcp.f32 %v2388_v37  ;;  %3322 = vmatprep.subr.bf16.mxu1 %v3798_v33  ;;  %v1691_v37 = vpack.c.bf16 %v685_v35, %v685_v35 }
 0x71b   : > { %v2358_v62 = vpop.xlane.xlu1 %2357  ;;  %v2465_v56 = vpack.c.bf16 %v2438_v30, %v2437_v57  ;;  %v2453_v41 = vmul.f32 %v3698_v42, %v4644_v20 }
 0x71c   : > { %v3700_v48 = vpop.eup %3699  ;;  %3709 = vrcp.f32 %v2358_v62  ;;  %v4938_v62 = vmov 0  }
 0x71d   : > { %3303 = vmatpush3.bf16.xpose.msra.mxu0 %v2465_v56  ;;  %v2360_v15 = vpop.xlane.xlu0 %2359  ;;  %v2454_v45 = vmul.f32 %v3700_v48, %v4648_v47 }
 0x71e   : > { %v3702_v25 = vpop.eup %3701  ;;  %3711 = vrcp.f32 %v2360_v15  ;;  %3304 = vmatprep.subr.bf16.mxu0 %v3798_v33 }
 0x71f   : > { %v2390_v0 = vpop.xlane.xlu1 %2389  ;;  %v2473_v9 = vpack.c.bf16 %v2454_v45, %v2453_v41  ;;  %v2439_v5 = vmul.f32 %v3702_v25, %v4652_v63 }
 0x720   : > { %v3704_v10 = vpop.eup %3703  ;;  %3713 = vrcp.f32 %v2390_v0 }
 0x721   : > { %3323 = vmatpush3.bf16.xpose.msra.mxu1 %v2473_v9  ;;  %v2392_v36 = vpop.xlane.xlu0 %2391  ;;  %v2440_v4 = vmul.f32 %v3704_v10, %v4656_v16 }
 0x722   : > { %v3706_v32 = vpop.eup %3705  ;;  %3715 = vrcp.f32 %v2392_v36  ;;  %3324 = vmatprep.subr.bf16.mxu1 %v3798_v33 }
 0x723   : > { %v2362_v20 = vpop.xlane.xlu1 %2361  ;;  %v2466_v47 = vpack.c.bf16 %v2440_v4, %v2439_v5  ;;  %v2455_v50 = vmul.f32 %v3706_v32, %v4660_v40 }
 0x724   : > { %v3708_v1 = vpop.eup %3707  ;;  %3717 = vrcp.f32 %v2362_v20  ;;  %v3465_v20 = vld [vmem:[%s4889_s9] sm:$0xff]  }
 0x725   : > { %3305 = vmatpush3.bf16.xpose.msra.mxu0 %v2466_v47  ;;  %v2364_v52 = vpop.xlane.xlu0 %2363  ;;  %v2456_v43 = vmul.f32 %v3708_v1, %v4664_v11  ;;  %v3466_v47 = vld [vmem:[%s4889_s9 + $0x8] sm:$0xff]   ;;  %v3467_v1 = vld [vmem:[%s4889_s9 + $0x10] sm:$0xff]  }
 0x726   : > { %v3710_v49 = vpop.eup %3709  ;;  %3719 = vrcp.f32 %v2364_v52  ;;  %3306 = vmatprep.subr.bf16.mxu0 %v3798_v33  ;;  %v3468_v52 = vld [vmem:[%s4889_s9 + $0x18] sm:$0xff]  }
 0x727   : > { %v2394_v63 = vpop.xlane.xlu1 %2393  ;;  %v2474_v16 = vpack.c.bf16 %v2456_v43, %v2455_v50  ;;  %v2441_v6 = vmul.f32 %v3710_v49, %v4668_v19  ;;  %v3725_v50 = vld [vmem:[%s3933_s30] sm:$0xff] }
 0x728   : > { %v3712_v61 = vpop.eup %3711  ;;  %3721 = vrcp.f32 %v2394_v63  ;;  %v2752_v43 = vunpack.c.l.bf16 %v3725_v50 }
 0x729   : > { %3325 = vmatpush3.bf16.xpose.msra.mxu1 %v2474_v16  ;;  %v2396_v39 = vpop.xlane.xlu0 %2395  ;;  %v2442_v22 = vmul.f32 %v3712_v61, %v4672_v58  ;;  %v2753_v16 = vunpack.c.h.bf16 %v3725_v50 }
 0x72a   : > { %v3714_v23 = vpop.eup %3713  ;;  %3723 = vrcp.f32 %v2396_v39  ;;  %3326 = vmatprep.subr.bf16.mxu1 %v3798_v33 }
 0x72b   : > { %v2562_v40 = vpop.permute.xlu1 %2561  ;;  %v2467_v11 = vpack.c.bf16 %v2442_v22, %v2441_v6  ;;  %v2457_v26 = vmul.f32 %v3714_v23, %v4675_v14  ;;  %v3726_v6 = vld [vmem:[%s3933_s30 + $0x8] sm:$0xff] }
 0x72c   : > { %v3716_v28 = vpop.eup %3715  ;;  %v2754_v22 = vunpack.c.l.bf16 %v3726_v6 }
 0x72d   : > { %3307 = vmatpush3.bf16.xpose.msra.mxu0 %v2467_v11  ;;  %v2458_v21 = vmul.f32 %v3716_v28, %v4678_v59  ;;  %v2755_v28 = vunpack.c.h.bf16 %v3726_v6  ;;  %v3731_v6 = vld [vmem:[%s3933_s30 + $0x30] sm:$0xff] }
 0x72e   : > { %v3718_v8 = vpop.eup %3717  ;;  %3308 = vmatprep.subr.bf16.mxu0 %v3798_v33 }
 0x72f   : > { %v1660_v17 = vpop.permute.xlu1 %1659  ;;  %v2475_v13 = vpack.c.bf16 %v2458_v21, %v2457_v26  ;;  %v2443_v31 = vmul.f32 %v3718_v8, %v4681_v53 }
 0x730   : > { %v3720_v19 = vpop.eup %3719  ;;  %v1667_v53 = vmul.f32 %v1660_v17, %v4465_v55 }
 0x731   : > { %3327 = vmatpush3.bf16.xpose.msra.mxu1 %v2475_v13  ;;  %v2567_v58 = vpop.permute.xlu0 %2566  ;;  %v2444_v38 = vmul.f32 %v3720_v19, %v4684_v46 }
 0x732   : > { %v3722_v27 = vpop.eup %3721  ;;  %3328 = vmatprep.subr.bf16.mxu1 %v3798_v33 }
 0x733   : > { %v1665_v51 = vpop.permute.xlu1 %1664  ;;  %v2468_v2 = vpack.c.bf16 %v2444_v38, %v2443_v31  ;;  %v2459_v3 = vmul.f32 %v3722_v27, %v4687_v44  ;;  %v1692_v44 = vpack.c.bf16 %v4382_v12, %v4382_v12 }
 0x734   : > { %v3724_v14 = vpop.eup %3723  ;;  %v1668_v33 = vmul.f32 %v1665_v51, %v4467_v24  ;;  %v3727_v51 = vld [vmem:[%s3933_s30 + $0x10] sm:$0xff] }
 0x735   : > { %3309 = vmatpush3.bf16.xpose.msra.mxu0 %v2468_v2  ;;  %v2576_v59 = vpop.permute.xlu0 %2575  ;;  %v2460_v18 = vmul.f32 %v3724_v14, %v4690_v7  ;;  %v2756_v2 = vunpack.c.l.bf16 %v3727_v51 }
 0x737   : > { %v2581_v54 = vpop.permute.xlu1 %2580  ;;  %v2476_v29 = vpack.c.bf16 %v2460_v18, %v2459_v3  ;;  %v2757_v18 = vunpack.c.h.bf16 %v3727_v51 }
 0x739   : > { %3329 = vmatpush3.bf16.xpose.msra.mxu1 %v2476_v29  ;;  %v1674_v46 = vpop.permute.xlu0 %1673 }
 0x73a   : > { %v1681_v57 = vadd.f32 %v1674_v46, %v1667_v53 }
 0x73b   : > { %v1679_v30 = vpop.permute.xlu1 %1678 }
 0x73c   : > { %v1682_v42 = vadd.f32 %v1679_v30, %v1668_v33  ;;  %3311 = vmatmul.mubr.bf16.vlgmr.msra.gmra.mrb[36].mxu0 %v1691_v37  ;;  %v1683_v7 = vmax.f32 %v1681_v57, 0.0 }
 0x73d   : > { %2711 = vmatprep.mubr.bf16.mxu0 %v4938_v62  ;;  %v2610_v49 = vpop.permute.xlu0 %2609 }
 0x73e   : > { %v1684_v34 = vmax.f32 %v1682_v42, 0.0 }
 0x73f   : > { %v2615_v23 = vpop.permute.xlu1 %2614 }
 0x740   : > { %v1685_v56 = vpack.c.bf16 %v1684_v34, %v1683_v7  ;;  %3331 = vmatmul.mubr.bf16.vlgmr.msra.gmra.mrb[52].mxu1 %v1692_v44 }
 0x741   : > { %v2620_v14 = vpop.permute.xlu0 %2619 }
 0x743   : > { %v2625_v53 = vpop.permute.xlu1 %2624 }
 0x80f   : > { %v2511_v48 = vpop.f32.mrb[36].mxu0 }
 0x810   : > { %v2569_v55 = vmul.f32 %v2562_v40, %v2511_v48  ;;  %v3312_v15 = vpop.f32.mrb[37].mxu0 }
 0x811   : > { %v2514_v41 = vpop.f32.mrb[38].mxu0  ;;  %v3729_v15 = vld [vmem:[%s3933_s30 + $0x20] sm:$0xff] }
 0x812   : > { %v3313_v45 = vpop.f32.mrb[39].mxu0  ;;  %v2583_v24 = vadd.f32 %v2576_v59, %v2569_v55  ;;  %v2760_v41 = vunpack.c.l.bf16 %v3729_v15 }
 0x813   : > { %v2551_v25 = vpop.f32.mrb[52].mxu1  ;;  %v2630_v45 = vpop.permute.xlu0 %2629 }
 0x814   : > { %v2570_v0 = vmul.f32 %v2567_v58, %v2551_v25  ;;  %v3332_v9 = vpop.f32.mrb[53].mxu1  ;;  %v2585_v4 = vmax.f32 %v2583_v24, 0.0 }
 0x815   : > { %v2554_v10 = vpop.f32.mrb[54].mxu1 }
 0x816   : > { %v2584_v36 = vadd.f32 %v2581_v54, %v2570_v0  ;;  %v3333_v5 = vpop.f32.mrb[55].mxu1  ;;  %v3728_v54 = vld [vmem:[%s3933_s30 + $0x18] sm:$0xff]  ;;  %v2761_v0 = vunpack.c.h.bf16 %v3729_v15 }
 0x817   : > { %v2758_v29 = vunpack.c.l.bf16 %v3728_v54  ;;  %v2759_v33 = vunpack.c.h.bf16 %v3728_v54 }
 0x818   : > { %v2586_v32 = vmax.f32 %v2584_v36, 0.0  ;;  %v3730_v36 = vld [vmem:[%s3933_s30 + $0x28] sm:$0xff] }
 0x819   : > { %v2762_v5 = vunpack.c.l.bf16 %v3730_v36 }
 0x81a   : > { %v2587_v12 = vpack.c.bf16 %v2586_v32, %v2585_v4  ;;  %v2635_v4 = vpop.permute.xlu1 %2634 }
 0x81c   : > { %2679 = vmatprep.subr.bf16.mxu0 %v2587_v12 }
 0x81d   : > { %2680 = vmatpush1.bf16.msra.mxu0 %v1685_v56 }
 0x820   : > { %2991 = vmatmul.mubr.msk.bf16.vlgmr.msra.gmra.mrb[40].mxu0 %vm628_vm1, %v3465_v20  ;;  %v2763_v20 = vunpack.c.h.bf16 %v3730_v36 }
 0x821   : > { %2721 = vmatprep.mubr.bf16.mxu0 %v4938_v62 }
 0x828   : > { %2992 = vmatmul.mubr.msk.bf16.gmra.mrb[44].mxu0 %vm628_vm1, %v3466_v47 }
 0x829   : > { %2731 = vmatprep.mubr.bf16.mxu0 %v4938_v62 }
 0x830   : > { %2993 = vmatmul.mubr.msk.bf16.gmra.mrb[48].mxu0 %vm628_vm1, %v3467_v1 }
 0x831   : > { %2741 = vmatprep.mubr.bf16.mxu0 %v4938_v62 }
 0x838   : > { %2994 = vmatmul.mubr.msk.bf16.gmra.mrb[52].mxu0 %vm628_vm1, %v3468_v52 }
 0x8f3   : > { %v2713_v63 = vpop.f32.mrb[40].mxu0 }
 0x8f4   : > { %v2714_v61 = vadd.f32 %v2713_v63, %v2610_v49  ;;  %v2715_v39 = vpop.f32.mrb[41].mxu0 }
 0x8f5   : > { %v2716_v40 = vadd.f32 %v2715_v39, %v2610_v49  ;;  %v2717_v11 = vpop.f32.mrb[42].mxu0 }
 0x8f6   : > { %v2768_v26 = vadd.f32 %v2752_v43, %v2714_v61  ;;  %v2718_v21 = vadd.f32 %v2717_v11, %v2615_v23  ;;  %v2719_v8 = vpop.f32.mrb[43].mxu0 }
 0x8f7   : > { %v2769_v17 = vadd.f32 %v2753_v16, %v2716_v40  ;;  %v2720_v13 = vadd.f32 %v2719_v8, %v2615_v23  ;;  %v2640_v23 = vpop.permute.xlu0 %2639  ;;  %v3732_v8 = vld [vmem:[%s3933_s30 + $0x38] sm:$0xff] }
 0x8f8   : > { %v2784_v19 = vmax.f32 %v2768_v26, 0.0  ;;  %v2770_v58 = vadd.f32 %v2754_v22, %v2718_v21  ;;  %v2764_v22 = vunpack.c.l.bf16 %v3731_v6 }
 0x8f9   : > { %v2785_v31 = vmax.f32 %v2769_v17, 0.0  ;;  %v2771_v38 = vadd.f32 %v2755_v28, %v2720_v13  ;;  %v2765_v28 = vunpack.c.h.bf16 %v3731_v6  ;;  %v2766_v17 = vunpack.c.l.bf16 %v3732_v8  ;;  %v2645_v13 = vpop.permute.xlu1 %2644 }
 0x8fa   : > { %2800 = vst [vmem:[%s4804_s24] sm:$0xff] %v2784_v19  ;;  %v2786_v27 = vmax.f32 %v2770_v58, 0.0 }
 0x8fb   : > { %2801 = vst [vmem:[%s4804_s24 + $0x8] sm:$0xff] %v2785_v31  ;;  %v2787_v59 = vmax.f32 %v2771_v38, 0.0  ;;  %v2723_v3 = vpop.f32.mrb[44].mxu0  ;;  %v2767_v31 = vunpack.c.h.bf16 %v3732_v8 }
 0x8fc   : > { %2802 = vst [vmem:[%s4804_s24 + $0x10] sm:$0xff] %v2786_v27  ;;  %v2724_v60 = vadd.f32 %v2723_v3, %v2620_v14  ;;  %v2725_v35 = vpop.f32.mrb[45].mxu0 }
 0x8fd   : > { %2803 = vst [vmem:[%s4804_s24 + $0x18] sm:$0xff] %v2787_v59  ;;  %v2726_v46 = vadd.f32 %v2725_v35, %v2620_v14  ;;  %v2727_v37 = vpop.f32.mrb[46].mxu0 }
 0x8fe   : > { %v2772_v57 = vadd.f32 %v2756_v2, %v2724_v60  ;;  %v2728_v30 = vadd.f32 %v2727_v37, %v2625_v53  ;;  %v2729_v42 = vpop.f32.mrb[47].mxu0 }
 0x8ff   : > { %v2773_v62 = vadd.f32 %v2757_v18, %v2726_v46  ;;  %v2730_v44 = vadd.f32 %v2729_v42, %v2625_v53 }
 0x900   : > { %v2788_v7 = vmax.f32 %v2772_v57, 0.0  ;;  %v2774_v34 = vadd.f32 %v2758_v29, %v2728_v30 }
 0x901   : > { %v2789_v56 = vmax.f32 %v2773_v62, 0.0  ;;  %v2775_v48 = vadd.f32 %v2759_v33, %v2730_v44 }
 0x902   : > { %2804 = vst [vmem:[%s4804_s24 + $0x20] sm:$0xff] %v2788_v7  ;;  %v2790_v55 = vmax.f32 %v2774_v34, 0.0 }
 0x903   : > { %2805 = vst [vmem:[%s4804_s24 + $0x28] sm:$0xff] %v2789_v56  ;;  %v2791_v25 = vmax.f32 %v2775_v48, 0.0  ;;  %v2733_v24 = vpop.f32.mrb[48].mxu0 }
 0x904   : > { %2806 = vst [vmem:[%s4804_s24 + $0x30] sm:$0xff] %v2790_v55  ;;  %v2734_v9 = vadd.f32 %v2733_v24, %v2630_v45  ;;  %v2735_v10 = vpop.f32.mrb[49].mxu0 }
 0x905   : > { %2807 = vst [vmem:[%s4804_s24 + $0x38] sm:$0xff] %v2791_v25  ;;  %v2736_v32 = vadd.f32 %v2735_v10, %v2630_v45  ;;  %v2737_v12 = vpop.f32.mrb[50].mxu0 }
 0x906   : > { %v2776_v47 = vadd.f32 %v2760_v41, %v2734_v9  ;;  %v2738_v1 = vadd.f32 %v2737_v12, %v2635_v4  ;;  %v2739_v52 = vpop.f32.mrb[51].mxu0 }
 0x907   : > { %v2777_v50 = vadd.f32 %v2761_v0, %v2736_v32  ;;  %v2740_v43 = vadd.f32 %v2739_v52, %v2635_v4 }
 0x908   : > { %v2792_v49 = vmax.f32 %v2776_v47, 0.0  ;;  %v2778_v63 = vadd.f32 %v2762_v5, %v2738_v1 }
 0x909   : > { %v2793_v16 = vmax.f32 %v2777_v50, 0.0  ;;  %v2779_v61 = vadd.f32 %v2763_v20, %v2740_v43 }
 0x90a   : > { %2808 = vst [vmem:[%s4804_s24 + $0x40] sm:$0xff] %v2792_v49  ;;  %v2794_v39 = vmax.f32 %v2778_v63, 0.0 }
 0x90b   : > { %2809 = vst [vmem:[%s4804_s24 + $0x48] sm:$0xff] %v2793_v16  ;;  %v2795_v40 = vmax.f32 %v2779_v61, 0.0  ;;  %v2743_v11 = vpop.f32.mrb[52].mxu0 }
 0x90c   : > { %2810 = vst [vmem:[%s4804_s24 + $0x50] sm:$0xff] %v2794_v39  ;;  %v2744_v26 = vadd.f32 %v2743_v11, %v2640_v23  ;;  %v2745_v21 = vpop.f32.mrb[53].mxu0 }
 0x90d   : > { %2811 = vst [vmem:[%s4804_s24 + $0x58] sm:$0xff] %v2795_v40  ;;  %v2746_v19 = vadd.f32 %v2745_v21, %v2640_v23  ;;  %v2747_v58 = vpop.f32.mrb[54].mxu0 }
 0x90e   : > { %v2780_v38 = vadd.f32 %v2764_v22, %v2744_v26  ;;  %v2748_v27 = vadd.f32 %v2747_v58, %v2645_v13  ;;  %v2749_v51 = vpop.f32.mrb[55].mxu0 }
 0x90f   : > { %v2781_v2 = vadd.f32 %v2765_v28, %v2746_v19  ;;  %v2750_v14 = vadd.f32 %v2749_v51, %v2645_v13 }
 0x910   : > { %v2796_v59 = vmax.f32 %v2780_v38, 0.0  ;;  %v2782_v3 = vadd.f32 %v2766_v17, %v2748_v27 }
 0x911   : > { %v2797_v18 = vmax.f32 %v2781_v2, 0.0  ;;  %v2783_v60 = vadd.f32 %v2767_v31, %v2750_v14 }
 0x912   : > { %2812 = vst [vmem:[%s4804_s24 + $0x60] sm:$0xff] %v2796_v59  ;;  %v2798_v35 = vmax.f32 %v2782_v3, 0.0 }
 0x913   : > { %2813 = vst [vmem:[%s4804_s24 + $0x68] sm:$0xff] %v2797_v18  ;;  %v2799_v54 = vmax.f32 %v2783_v60, 0.0 }
 0x914   : > { %2814 = vst [vmem:[%s4804_s24 + $0x70] sm:$0xff] %v2798_v35 }
 0x915   : > { %2815 = vst [vmem:[%s4804_s24 + $0x78] sm:$0xff] %v2799_v54 }
 0x916   : > { %3746 = shalt.err (!%p3743_p5)
}
 0x917   : > { %s3747_s24 = scalar_lea.hbm %s4830_s14, 2048  ;;  %s3751_s13 = scalar_lea.hbm %s4891_s11, 4096 }
 0x918   : > { %p3748_p7 = scmp.ne.s32.totalorder %s4830_s14, %s3747_s24  ;;  %p3752_p12 = scmp.lt.u32.totalorder %s4830_s14, %s4891_s11 }
 0x919   : > { %p3753_p13 = scmp.lt.u32.totalorder %s3751_s13, %s3747_s24  ;;  %p3755_p1 = scmp.lt.u32.totalorder %s3747_s24, %s4830_s14 }
 0x91a   : > { %p3749_p10 = pnand %p3748_p7, %p3902_p6 }
 0x91b   : > { %p3754_p0 = por %p3753_p13, %p3752_p12 }
 0x91c   : > { %p3750_p11 = pneg %p3749_p10 }
 0x91d   : > { %p3756_p2 = por %p3755_p1, %p3754_p0 }
 0x91f   : > { %p3757_p3 = pnand %p3756_p2, %p3750_p11 }
 0x921   : > { %3760 = shalt.err (!%p3757_p3)
}
 0x922   : > { %s3801_s20 = smov 256   ;;  %s3802_s28 = smov 512  }
 0x923   : > { %s3803_s15 = smov 16   ;;  %s4940_s29 = scalar_lea.sflag [#allocation5], %s3921_s16 }
 0x924   : > { %3406 = dma.vmem_to_hbm [thread:$0]  (%p3902_p6), %s4833_s12, 2048, %s4830_s14, %s4940_s29, %s3801_s20, %s3802_s28, %s3803_s15  }
 0x925 PF: > { %s2845_s30 = sand.u32 1, %s3783_s17   ;;  %p3409_p4 = pnand %p2900_p9, %p3906_p8 }
 0x926   : > { %s2846_s24 = scalar_lea.sflag [#allocation5], %s2845_s30 }
 0x927   : > { %3778 = dma.done.wait (!%p3409_p4), %s2846_s24, 2048  }
 0x928   : > { %3780 = vsyncadd (!%p3409_p4), %s2846_s24, 4294965248  ;;  %p21_p5 = scmp.ge.s32.totalorder %s3887_s22, 4   ;;  %s4941_s17 = smov %s3787_s6 }
 0x929   : > { %s4942_s6 = smov %s3791_s18  ;;  %s4943_s18 = smov %s3900_s25 }
 0x92a   : > { %s4944_s19 = smov %s3887_s22  ;;  %23 = sbr.rel (!%p21_p5) target bundleno = 3 (0x3), region = 142 }
 0x931   :  { %2851 = vsyncpa [#allocation5], 1 }
 0x932   :  { %2853 = vsyncpa [#allocation5 + $0x1], 1 }

</bundles_post_ra>
